<compile_context>
chip_gen: v7x
topology: tpu7x:2x2x1
jax: 0.10.0
libtpu: 0.0.40
codegen_flags: <defaults>
</compile_context>

<pallas_src>
import jax
import jax.numpy as jnp
from jax import lax
from jax.experimental import pallas as pl
from jax.experimental.pallas import tpu as pltpu

K = 7            # conv kernel size
PAD = 3          # conv padding
TB_MAX = 8       # batch elements packed per grid step (sublane packing)
LANE_STRIP = 1024  # conv lane-strip width (multiple of 128)


def _round_up(v, m):
    return ((v + m - 1) // m) * m


def _vmem_budget_bytes():
    """Conservative, generation-aware scoped-VMEM budget."""
    phys = 64 << 20          # v7x per-TensorCore VMEM (safe default)
    try:
        fn = getattr(pltpu, "get_tpu_info", None)
        if fn is not None:
            info = fn()
            phys = int(getattr(info, "vmem_capacity_bytes", phys) or phys)
    except Exception:
        pass
    # leave headroom for compiler-internal scratch / double buffers
    return int(min(phys * 3 // 4, 100 << 20))


def _make_kernel(TB, C, W, HW, CC, pad_l, flat):
    n_full = C // CC
    c_rem = C - n_full * CC
    f32 = jnp.float32

    def kernel(w_ref, b_ref, mask_ref, x_ref, y_ref, ms_ref, pad_max, pad_avg):
        # w_ref   : (2*K*K,) f32 SMEM   flattened conv weight [in_ch, kh, kw];
        #                               avg-channel weights carry the 1/C factor
        # b_ref   : (1,)     f32 SMEM
        # mask_ref: (K, HW)  f32 VMEM   {0,1} column-validity mask per kj offset
        # x_ref   : (TB, C, HW) VMEM block (native dtype)
        # y_ref   : (TB, C, HW) VMEM block
        # ms_ref  : (TB, 1, HW) VMEM block
        # pad_max / pad_avg : (TB, flat) f32 scratch — flat zero-padded pooled
        #                     maps, batch packed along sublanes.

        # --- re-zero only the lane-aligned halos; the interior is fully
        #     rewritten every grid step.  (Done every step on purpose: scratch
        #     is per-core, and with "parallel" megacore sharding a core may
        #     never see program_id == 0.) ---
        pad_r = flat - pad_l - HW
        zl = jnp.zeros((TB, pad_l), f32)
        zr = jnp.zeros((TB, pad_r), f32)
        pad_max[:, 0:pad_l] = zl
        pad_avg[:, 0:pad_l] = zl
        pad_max[:, pad_l + HW:flat] = zr
        pad_avg[:, pad_l + HW:flat] = zr

        # --- fused single-pass channel max + sum per batch row, staged packed
        #     (batch on sublanes) into the flat padded conv buffers ---
        def pool_batch(b, carry):
            mx0 = jnp.full((1, HW), -jnp.inf, f32)
            sm0 = jnp.zeros((1, HW), f32)

            def pool_chunk(ci, mc):
                mx, sm = mc
                cs = pl.multiple_of(ci * CC, CC)
                blk = x_ref[b, pl.ds(cs, CC), :].astype(f32)       # (CC, HW)
                mx = jnp.maximum(mx, jnp.max(blk, axis=0, keepdims=True))
                sm = sm + jnp.sum(blk, axis=0, keepdims=True)
                return mx, sm

            if n_full > 0:
                mx, sm = lax.fori_loop(0, n_full, pool_chunk, (mx0, sm0))
            else:
                mx, sm = mx0, sm0
            if c_rem > 0:
                blk = x_ref[b, n_full * CC:C, :].astype(f32)       # (c_rem, HW)
                mx = jnp.maximum(mx, jnp.max(blk, axis=0, keepdims=True))
                sm = sm + jnp.sum(blk, axis=0, keepdims=True)

            pad_max[pl.ds(b, 1), pad_l:pad_l + HW] = mx
            pad_avg[pl.ds(b, 1), pad_l:pad_l + HW] = sm   # 1/C folded in weights
            return carry

        lax.fori_loop(0, TB, pool_batch, 0)

        # --- 7x7 conv (2 -> 1 ch) + sigmoid, sublane-packed over the TB batch
        #     rows and strip-mined over lanes.  Every tap is a contiguous
        #     lane-offset read of the flat padded buffers; the column mask is
        #     applied once per kj (reassociated). ---
        bias = b_ref[0]
        for ls in range(0, HW, LANE_STRIP):
            wl = min(LANE_STRIP, HW - ls)
            acc = jnp.full((TB, wl), bias, f32)
            for kj in range(K):
                inner = None
                for ki in range(K):
                    off = pad_l + (ki - PAD) * W + (kj - PAD) + ls
                    tap = (w_ref[ki * K + kj] * pad_max[:, off:off + wl]
                           + w_ref[K * K + ki * K + kj] * pad_avg[:, off:off + wl])
                    inner = tap if inner is None else inner + tap
                acc = acc + mask_ref[kj:kj + 1, ls:ls + wl] * inner
            ms_ref[:, 0, ls:ls + wl] = jax.nn.sigmoid(acc).astype(ms_ref.dtype)

        # --- y = Ms * x in the native dtype (chunked, lane-dense stores) ---
        def scale_batch(b, carry):
            ms_row = ms_ref[pl.ds(b, 1), 0, :]                     # (1, HW)
            if n_full > 0:
                # hoist the broadcast out of the chunk loop (no CSE in-loop)
                ms_bc = jnp.broadcast_to(ms_row, (CC, HW))

                def scale_chunk(ci, c2):
                    cs = pl.multiple_of(ci * CC, CC)
                    xb = x_ref[b, pl.ds(cs, CC), :]                # (CC, HW)
                    y_ref[b, pl.ds(cs, CC), :] = (xb * ms_bc).astype(y_ref.dtype)
                    return c2

                lax.fori_loop(0, n_full, scale_chunk, 0)
            if c_rem > 0:
                cs0 = n_full * CC
                xb = x_ref[b, cs0:C, :]
                y_ref[b, cs0:C, :] = (xb * ms_row).astype(y_ref.dtype)
            return carry

        lax.fori_loop(0, TB, scale_batch, 0)

    return kernel


def spatial_attention(x, conv_w, conv_b):
    """x: (N, C, H, W); conv_w: (1, 2, 7, 7); conv_b: (1,). Returns (y, Ms)."""
    N, C, H, W = x.shape
    HW = H * W
    out_dtype = x.dtype
    itemsize = jnp.dtype(x.dtype).itemsize

    # dtype-aware channel chunk: full native sublane tile per chunk
    CC = max(8, 32 // itemsize)

    # flat padded conv-buffer geometry (lane-aligned halos)
    lpad = PAD * W + PAD
    pad_l = _round_up(lpad, 128)
    flat = pad_l + HW + _round_up(lpad, 128)

    # --- per-generation block / VMEM sizing ---
    budget = _vmem_budget_bytes()
    per_batch = C * HW * itemsize
    # x + y double-buffered, ms double-buffered, two f32 staging rows
    per_tb = 4 * per_batch + 2 * HW * itemsize + 2 * flat * 4
    fixed = 2 * K * HW * 4 + (6 << 20)            # masks + slack
    tb_cap = max(1, (budget - fixed) // max(per_tb, 1))
    tb = int(max(1, min(N, TB_MAX, tb_cap)))
    while N % tb:
        tb -= 1
    # prefer enough grid steps for pipelining / both v7x TensorCores, but do
    # not shrink blocks below ~1 MiB once >= 2 steps exist
    target_steps = min(N, 8)
    while tb > 1 and (N // tb) < target_steps:
        nxt = tb - 1
        while N % nxt:
            nxt -= 1
        if (N // tb) >= 2 and nxt * per_batch < (1 << 20):
            break
        tb = nxt
    grid = (N // tb,)

    vmem_need = fixed + tb * per_tb
    vmem_limit = int(min(max(vmem_need, 16 << 20), budget))
    # TODO(synk): for very large C*H*W where even a tb=1 block exceeds the VMEM
    # budget, add a C-tiled two-pass fallback (Ms pass + scale pass).

    # column-border validity masks ({0,1} f32), one per kj tap offset
    col = jnp.arange(HW, dtype=jnp.int32) % W
    col_mask = jnp.stack(
        [((col >= PAD - kj) & (col < W + PAD - kj)).astype(jnp.float32)
         for kj in range(K)], axis=0)                              # (K, HW)

    # flatten weights; fold the 1/C mean factor into the avg-channel weights
    w0 = conv_w[0, 0].astype(jnp.float32).reshape(-1)              # max channel
    w1 = (conv_w[0, 1].astype(jnp.float32) / float(C)).reshape(-1)  # avg channel
    w_flat = jnp.concatenate([w0, w1], axis=0)                     # (98,)
    b = conv_b.reshape(1).astype(jnp.float32)                      # (1,)

    x2 = x.reshape(N, C, HW)                                       # lane-dense

    kernel = _make_kernel(tb, C, W, HW, CC, pad_l, flat)

    y2, ms2 = pl.pallas_call(
        kernel,
        out_shape=(
            jax.ShapeDtypeStruct((N, C, HW), out_dtype),
            jax.ShapeDtypeStruct((N, 1, HW), out_dtype),
        ),
        grid_spec=pltpu.PrefetchScalarGridSpec(
            num_scalar_prefetch=0,
            grid=grid,
            in_specs=[
                pl.BlockSpec(memory_space=pltpu.MemorySpace.SMEM),   # conv w
                pl.BlockSpec(memory_space=pltpu.MemorySpace.SMEM),   # conv b
                pl.BlockSpec((K, HW), lambda n: (0, 0)),             # col masks
                pl.BlockSpec((tb, C, HW), lambda n: (n, 0, 0)),      # x
            ],
            out_specs=[
                pl.BlockSpec((tb, C, HW), lambda n: (n, 0, 0)),      # y
                pl.BlockSpec((tb, 1, HW), lambda n: (n, 0, 0)),      # Ms
            ],
            scratch_shapes=[
                pltpu.VMEM((tb, flat), jnp.float32),                 # padded max
                pltpu.VMEM((tb, flat), jnp.float32),                 # padded sum
            ],
        ),
        compiler_params=pltpu.CompilerParams(
            dimension_semantics=("parallel",),
            vmem_limit_bytes=vmem_limit,
        ),
    )(w_flat, b, col_mask, x2)

    return y2.reshape(N, C, H, W), ms2.reshape(N, 1, H, W)


def spatial_attention_reference(x, conv_w, conv_b):
    """Pure-JAX reference mirroring the PyTorch forward."""
    max_pool = jnp.max(x, axis=1, keepdims=True)
    avg_pool = jnp.mean(x, axis=1, keepdims=True)
    x_cat = jnp.concatenate([max_pool, avg_pool], axis=1)          # (N, 2, H, W)
    conv = lax.conv_general_dilated(
        x_cat, conv_w, window_strides=(1, 1),
        padding=[(PAD, PAD), (PAD, PAD)],
        dimension_numbers=("NCHW", "OIHW", "NCHW"),
    ) + conv_b.reshape(1, 1, 1, 1)
    ms = jax.nn.sigmoid(conv)
    return ms * x, ms


if __name__ == "__main__":
    N, C, H, W = 2, 4, 16, 16

    key = jax.random.PRNGKey(0)
    kx, kw, kb = jax.random.split(key, 3)

    # Deterministic parameter init (Conv2d(2, 1, 7, padding=3)-shaped weights).
    fan_in = 2 * K * K
    bound = float(1.0 / (fan_in ** 0.5))
    conv_w = jax.random.uniform(kw, (1, 2, K, K), jnp.float32, -bound, bound)
    conv_b = jax.random.uniform(kb, (1,), jnp.float32, -bound, bound)
    x = jax.random.normal(kx, (N, C, H, W), dtype=jnp.float32)

    y, ms = spatial_attention(x, conv_w, conv_b)
    y = jax.block_until_ready(y)
    ms = jax.block_until_ready(ms)

    y_exp, ms_exp = spatial_attention_reference(x, conv_w, conv_b)
    assert y.shape == (N, C, H, W) and ms.shape == (N, 1, H, W)
    assert jnp.allclose(ms, ms_exp, atol=1e-4, rtol=1e-4)
    assert jnp.allclose(y, y_exp, atol=1e-4, rtol=1e-4)

    print("KERNEL_OK")
</pallas_src>

<mosaic_0001>
module attributes {stable_mosaic.version = 11 : i64} {
  func.func @kernel(%arg0: i32, %arg1: memref<98xf32, #tpu.memory_space<smem>>, %arg2: memref<1xf32, #tpu.memory_space<smem>>, %arg3: memref<7x256xf32, #tpu.memory_space<vmem>>, %arg4: memref<1x4x256xf32, #tpu.memory_space<vmem>>, %arg5: memref<1x4x256xf32, #tpu.memory_space<vmem>>, %arg6: memref<1x1x256xf32, #tpu.memory_space<vmem>>, %arg7: memref<1x512xf32, #tpu.memory_space<vmem>>, %arg8: memref<1x512xf32, #tpu.memory_space<vmem>>) attributes {dimension_semantics = [#tpu.dimension_semantics<parallel>], iteration_bounds = array<i64: 2>, scalar_prefetch = 0 : i64, scratch_operands = 2 : i64, tpu.core_type = #tpu.core_type<tc>, window_params = [{transform_indices = @transform_0, window_bounds = array<i64: 98>}, {transform_indices = @transform_1, window_bounds = array<i64: 1>}, {pipeline_mode = #tpu.pipeline_mode<synchronous>, transform_indices = @transform_2, window_bounds = array<i64: 7, 256>}, {transform_indices = @transform_3, window_bounds = array<i64: 1, 4, 256>}, {transform_indices = @transform_4, window_bounds = array<i64: 1, 4, 256>}, {transform_indices = @transform_5, window_bounds = array<i64: 1, 1, 256>}]} {
    %cst = arith.constant 0.000000e+00 : f32
    %0 = vector.broadcast %cst : f32 to vector<1x128xf32>
    %cst_0 = arith.constant 0.000000e+00 : f32
    %1 = vector.broadcast %cst_0 : f32 to vector<1x128xf32>
    %c0 = arith.constant 0 : index
    %c0_1 = arith.constant 0 : index
    %2 = vector.load %arg7[%c0, %c0_1] : memref<1x512xf32, #tpu.memory_space<vmem>>, vector<1x128xf32>
    tpu.vector_store %arg7[%c0, %c0_1], %0 {strides = array<i32>} : memref<1x512xf32, #tpu.memory_space<vmem>>, vector<1x128xf32>,
    %c0_2 = arith.constant 0 : index
    %c0_3 = arith.constant 0 : index
    %3 = vector.load %arg8[%c0_2, %c0_3] : memref<1x512xf32, #tpu.memory_space<vmem>>, vector<1x128xf32>
    tpu.vector_store %arg8[%c0_2, %c0_3], %0 {strides = array<i32>} : memref<1x512xf32, #tpu.memory_space<vmem>>, vector<1x128xf32>,
    %c0_4 = arith.constant 0 : index
    %c384 = arith.constant 384 : index
    %4 = vector.load %arg7[%c0_4, %c384] : memref<1x512xf32, #tpu.memory_space<vmem>>, vector<1x128xf32>
    tpu.vector_store %arg7[%c0_4, %c384], %1 {strides = array<i32>} : memref<1x512xf32, #tpu.memory_space<vmem>>, vector<1x128xf32>,
    %c0_5 = arith.constant 0 : index
    %c384_6 = arith.constant 384 : index
    %5 = vector.load %arg8[%c0_5, %c384_6] : memref<1x512xf32, #tpu.memory_space<vmem>>, vector<1x128xf32>
    tpu.vector_store %arg8[%c0_5, %c384_6], %1 {strides = array<i32>} : memref<1x512xf32, #tpu.memory_space<vmem>>, vector<1x128xf32>,
    %c0_i32 = arith.constant 0 : i32
    %cst_7 = arith.constant 0xFF800000 : f32
    %6 = vector.broadcast %cst_7 : f32 to vector<1x256xf32>
    %cst_8 = arith.constant 0.000000e+00 : f32
    %7 = vector.broadcast %cst_8 : f32 to vector<1x256xf32>
    %8 = arith.index_cast %c0_i32 : i32 to index
    %c0_9 = arith.constant 0 : index
    %c0_10 = arith.constant 0 : index
    %9 = vector.load %arg4[%8, %c0_9, %c0_10] : memref<1x4x256xf32, #tpu.memory_space<vmem>>, vector<1x4x256xf32>
    %10 = vector.shape_cast %9 : vector<1x4x256xf32> to vector<4x256xf32>
    %cst_11 = arith.constant dense<0xFF800000> : vector<256xf32>
    %11 = vector.multi_reduction <maximumf>, %10, %cst_11 [0] : vector<4x256xf32> to vector<256xf32>
    %12 = vector.shape_cast %11 : vector<256xf32> to vector<1x256xf32>
    %13 = arith.maximumf %6, %12 : vector<1x256xf32>
    %cst_12 = arith.constant dense<0.000000e+00> : vector<256xf32>
    %14 = vector.multi_reduction <add>, %10, %cst_12 [0] : vector<4x256xf32> to vector<256xf32>
    %15 = vector.shape_cast %14 : vector<256xf32> to vector<1x256xf32>
    %16 = arith.addf %7, %15 : vector<1x256xf32>
    %17 = arith.index_cast %c0_i32 : i32 to index
    %c128 = arith.constant 128 : index
    %18 = vector.load %arg7[%17, %c128] : memref<1x512xf32, #tpu.memory_space<vmem>>, vector<1x256xf32>
    tpu.vector_store %arg7[%17, %c128], %13 {strides = array<i32>} : memref<1x512xf32, #tpu.memory_space<vmem>>, vector<1x256xf32>,
    %19 = arith.index_cast %c0_i32 : i32 to index
    %c128_13 = arith.constant 128 : index
    %20 = vector.load %arg8[%19, %c128_13] : memref<1x512xf32, #tpu.memory_space<vmem>>, vector<1x256xf32>
    tpu.vector_store %arg8[%19, %c128_13], %16 {strides = array<i32>} : memref<1x512xf32, #tpu.memory_space<vmem>>, vector<1x256xf32>,
    %c1_i32 = arith.constant 1 : i32
    %c0_14 = arith.constant 0 : index
    %21 = memref.load %arg2[%c0_14] : memref<1xf32, #tpu.memory_space<smem>>
    %22 = vector.broadcast %21 : f32 to vector<1x256xf32>
    %c0_15 = arith.constant 0 : index
    %23 = memref.load %arg1[%c0_15] : memref<98xf32, #tpu.memory_space<smem>>
    %c0_16 = arith.constant 0 : index
    %c77 = arith.constant 77 : index
    %24 = vector.load %arg7[%c0_16, %c77] : memref<1x512xf32, #tpu.memory_space<vmem>>, vector<1x256xf32>
    %25 = vector.broadcast %23 : f32 to vector<1x256xf32>
    %26 = arith.mulf %25, %24 : vector<1x256xf32>
    %c49 = arith.constant 49 : index
    %27 = memref.load %arg1[%c49] : memref<98xf32, #tpu.memory_space<smem>>
    %c0_17 = arith.constant 0 : index
    %c77_18 = arith.constant 77 : index
    %28 = vector.load %arg8[%c0_17, %c77_18] : memref<1x512xf32, #tpu.memory_space<vmem>>, vector<1x256xf32>
    %29 = vector.broadcast %27 : f32 to vector<1x256xf32>
    %30 = arith.mulf %29, %28 : vector<1x256xf32>
    %31 = arith.addf %26, %30 : vector<1x256xf32>
    %c7 = arith.constant 7 : index
    %32 = memref.load %arg1[%c7] : memref<98xf32, #tpu.memory_space<smem>>
    %c0_19 = arith.constant 0 : index
    %c93 = arith.constant 93 : index
    %33 = vector.load %arg7[%c0_19, %c93] : memref<1x512xf32, #tpu.memory_space<vmem>>, vector<1x256xf32>
    %34 = vector.broadcast %32 : f32 to vector<1x256xf32>
    %35 = arith.mulf %34, %33 : vector<1x256xf32>
    %c56 = arith.constant 56 : index
    %36 = memref.load %arg1[%c56] : memref<98xf32, #tpu.memory_space<smem>>
    %c0_20 = arith.constant 0 : index
    %c93_21 = arith.constant 93 : index
    %37 = vector.load %arg8[%c0_20, %c93_21] : memref<1x512xf32, #tpu.memory_space<vmem>>, vector<1x256xf32>
    %38 = vector.broadcast %36 : f32 to vector<1x256xf32>
    %39 = arith.mulf %38, %37 : vector<1x256xf32>
    %40 = arith.addf %35, %39 : vector<1x256xf32>
    %41 = arith.addf %31, %40 : vector<1x256xf32>
    %c14 = arith.constant 14 : index
    %42 = memref.load %arg1[%c14] : memref<98xf32, #tpu.memory_space<smem>>
    %c0_22 = arith.constant 0 : index
    %c109 = arith.constant 109 : index
    %43 = vector.load %arg7[%c0_22, %c109] : memref<1x512xf32, #tpu.memory_space<vmem>>, vector<1x256xf32>
    %44 = vector.broadcast %42 : f32 to vector<1x256xf32>
    %45 = arith.mulf %44, %43 : vector<1x256xf32>
    %c63 = arith.constant 63 : index
    %46 = memref.load %arg1[%c63] : memref<98xf32, #tpu.memory_space<smem>>
    %c0_23 = arith.constant 0 : index
    %c109_24 = arith.constant 109 : index
    %47 = vector.load %arg8[%c0_23, %c109_24] : memref<1x512xf32, #tpu.memory_space<vmem>>, vector<1x256xf32>
    %48 = vector.broadcast %46 : f32 to vector<1x256xf32>
    %49 = arith.mulf %48, %47 : vector<1x256xf32>
    %50 = arith.addf %45, %49 : vector<1x256xf32>
    %51 = arith.addf %41, %50 : vector<1x256xf32>
    %c21 = arith.constant 21 : index
    %52 = memref.load %arg1[%c21] : memref<98xf32, #tpu.memory_space<smem>>
    %c0_25 = arith.constant 0 : index
    %c125 = arith.constant 125 : index
    %53 = vector.load %arg7[%c0_25, %c125] : memref<1x512xf32, #tpu.memory_space<vmem>>, vector<1x256xf32>
    %54 = vector.broadcast %52 : f32 to vector<1x256xf32>
    %55 = arith.mulf %54, %53 : vector<1x256xf32>
    %c70 = arith.constant 70 : index
    %56 = memref.load %arg1[%c70] : memref<98xf32, #tpu.memory_space<smem>>
    %c0_26 = arith.constant 0 : index
    %c125_27 = arith.constant 125 : index
    %57 = vector.load %arg8[%c0_26, %c125_27] : memref<1x512xf32, #tpu.memory_space<vmem>>, vector<1x256xf32>
    %58 = vector.broadcast %56 : f32 to vector<1x256xf32>
    %59 = arith.mulf %58, %57 : vector<1x256xf32>
    %60 = arith.addf %55, %59 : vector<1x256xf32>
    %61 = arith.addf %51, %60 : vector<1x256xf32>
    %c28 = arith.constant 28 : index
    %62 = memref.load %arg1[%c28] : memref<98xf32, #tpu.memory_space<smem>>
    %c0_28 = arith.constant 0 : index
    %c141 = arith.constant 141 : index
    %63 = vector.load %arg7[%c0_28, %c141] : memref<1x512xf32, #tpu.memory_space<vmem>>, vector<1x256xf32>
    %64 = vector.broadcast %62 : f32 to vector<1x256xf32>
    %65 = arith.mulf %64, %63 : vector<1x256xf32>
    %c77_29 = arith.constant 77 : index
    %66 = memref.load %arg1[%c77_29] : memref<98xf32, #tpu.memory_space<smem>>
    %c0_30 = arith.constant 0 : index
    %c141_31 = arith.constant 141 : index
    %67 = vector.load %arg8[%c0_30, %c141_31] : memref<1x512xf32, #tpu.memory_space<vmem>>, vector<1x256xf32>
    %68 = vector.broadcast %66 : f32 to vector<1x256xf32>
    %69 = arith.mulf %68, %67 : vector<1x256xf32>
    %70 = arith.addf %65, %69 : vector<1x256xf32>
    %71 = arith.addf %61, %70 : vector<1x256xf32>
    %c35 = arith.constant 35 : index
    %72 = memref.load %arg1[%c35] : memref<98xf32, #tpu.memory_space<smem>>
    %c0_32 = arith.constant 0 : index
    %c157 = arith.constant 157 : index
    %73 = vector.load %arg7[%c0_32, %c157] : memref<1x512xf32, #tpu.memory_space<vmem>>, vector<1x256xf32>
    %74 = vector.broadcast %72 : f32 to vector<1x256xf32>
    %75 = arith.mulf %74, %73 : vector<1x256xf32>
    %c84 = arith.constant 84 : index
    %76 = memref.load %arg1[%c84] : memref<98xf32, #tpu.memory_space<smem>>
    %c0_33 = arith.constant 0 : index
    %c157_34 = arith.constant 157 : index
    %77 = vector.load %arg8[%c0_33, %c157_34] : memref<1x512xf32, #tpu.memory_space<vmem>>, vector<1x256xf32>
    %78 = vector.broadcast %76 : f32 to vector<1x256xf32>
    %79 = arith.mulf %78, %77 : vector<1x256xf32>
    %80 = arith.addf %75, %79 : vector<1x256xf32>
    %81 = arith.addf %71, %80 : vector<1x256xf32>
    %c42 = arith.constant 42 : index
    %82 = memref.load %arg1[%c42] : memref<98xf32, #tpu.memory_space<smem>>
    %c0_35 = arith.constant 0 : index
    %c173 = arith.constant 173 : index
    %83 = vector.load %arg7[%c0_35, %c173] : memref<1x512xf32, #tpu.memory_space<vmem>>, vector<1x256xf32>
    %84 = vector.broadcast %82 : f32 to vector<1x256xf32>
    %85 = arith.mulf %84, %83 : vector<1x256xf32>
    %c91 = arith.constant 91 : index
    %86 = memref.load %arg1[%c91] : memref<98xf32, #tpu.memory_space<smem>>
    %c0_36 = arith.constant 0 : index
    %c173_37 = arith.constant 173 : index
    %87 = vector.load %arg8[%c0_36, %c173_37] : memref<1x512xf32, #tpu.memory_space<vmem>>, vector<1x256xf32>
    %88 = vector.broadcast %86 : f32 to vector<1x256xf32>
    %89 = arith.mulf %88, %87 : vector<1x256xf32>
    %90 = arith.addf %85, %89 : vector<1x256xf32>
    %91 = arith.addf %81, %90 : vector<1x256xf32>
    %c0_38 = arith.constant 0 : index
    %c0_39 = arith.constant 0 : index
    %92 = vector.load %arg3[%c0_38, %c0_39] : memref<7x256xf32, #tpu.memory_space<vmem>>, vector<1x256xf32>
    %93 = arith.mulf %92, %91 : vector<1x256xf32>
    %94 = arith.addf %22, %93 : vector<1x256xf32>
    %c1 = arith.constant 1 : index
    %95 = memref.load %arg1[%c1] : memref<98xf32, #tpu.memory_space<smem>>
    %c0_40 = arith.constant 0 : index
    %c78 = arith.constant 78 : index
    %96 = vector.load %arg7[%c0_40, %c78] : memref<1x512xf32, #tpu.memory_space<vmem>>, vector<1x256xf32>
    %97 = vector.broadcast %95 : f32 to vector<1x256xf32>
    %98 = arith.mulf %97, %96 : vector<1x256xf32>
    %c50 = arith.constant 50 : index
    %99 = memref.load %arg1[%c50] : memref<98xf32, #tpu.memory_space<smem>>
    %c0_41 = arith.constant 0 : index
    %c78_42 = arith.constant 78 : index
    %100 = vector.load %arg8[%c0_41, %c78_42] : memref<1x512xf32, #tpu.memory_space<vmem>>, vector<1x256xf32>
    %101 = vector.broadcast %99 : f32 to vector<1x256xf32>
    %102 = arith.mulf %101, %100 : vector<1x256xf32>
    %103 = arith.addf %98, %102 : vector<1x256xf32>
    %c8 = arith.constant 8 : index
    %104 = memref.load %arg1[%c8] : memref<98xf32, #tpu.memory_space<smem>>
    %c0_43 = arith.constant 0 : index
    %c94 = arith.constant 94 : index
    %105 = vector.load %arg7[%c0_43, %c94] : memref<1x512xf32, #tpu.memory_space<vmem>>, vector<1x256xf32>
    %106 = vector.broadcast %104 : f32 to vector<1x256xf32>
    %107 = arith.mulf %106, %105 : vector<1x256xf32>
    %c57 = arith.constant 57 : index
    %108 = memref.load %arg1[%c57] : memref<98xf32, #tpu.memory_space<smem>>
    %c0_44 = arith.constant 0 : index
    %c94_45 = arith.constant 94 : index
    %109 = vector.load %arg8[%c0_44, %c94_45] : memref<1x512xf32, #tpu.memory_space<vmem>>, vector<1x256xf32>
    %110 = vector.broadcast %108 : f32 to vector<1x256xf32>
    %111 = arith.mulf %110, %109 : vector<1x256xf32>
    %112 = arith.addf %107, %111 : vector<1x256xf32>
    %113 = arith.addf %103, %112 : vector<1x256xf32>
    %c15 = arith.constant 15 : index
    %114 = memref.load %arg1[%c15] : memref<98xf32, #tpu.memory_space<smem>>
    %c0_46 = arith.constant 0 : index
    %c110 = arith.constant 110 : index
    %115 = vector.load %arg7[%c0_46, %c110] : memref<1x512xf32, #tpu.memory_space<vmem>>, vector<1x256xf32>
    %116 = vector.broadcast %114 : f32 to vector<1x256xf32>
    %117 = arith.mulf %116, %115 : vector<1x256xf32>
    %c64 = arith.constant 64 : index
    %118 = memref.load %arg1[%c64] : memref<98xf32, #tpu.memory_space<smem>>
    %c0_47 = arith.constant 0 : index
    %c110_48 = arith.constant 110 : index
    %119 = vector.load %arg8[%c0_47, %c110_48] : memref<1x512xf32, #tpu.memory_space<vmem>>, vector<1x256xf32>
    %120 = vector.broadcast %118 : f32 to vector<1x256xf32>
    %121 = arith.mulf %120, %119 : vector<1x256xf32>
    %122 = arith.addf %117, %121 : vector<1x256xf32>
    %123 = arith.addf %113, %122 : vector<1x256xf32>
    %c22 = arith.constant 22 : index
    %124 = memref.load %arg1[%c22] : memref<98xf32, #tpu.memory_space<smem>>
    %c0_49 = arith.constant 0 : index
    %c126 = arith.constant 126 : index
    %125 = vector.load %arg7[%c0_49, %c126] : memref<1x512xf32, #tpu.memory_space<vmem>>, vector<1x256xf32>
    %126 = vector.broadcast %124 : f32 to vector<1x256xf32>
    %127 = arith.mulf %126, %125 : vector<1x256xf32>
    %c71 = arith.constant 71 : index
    %128 = memref.load %arg1[%c71] : memref<98xf32, #tpu.memory_space<smem>>
    %c0_50 = arith.constant 0 : index
    %c126_51 = arith.constant 126 : index
    %129 = vector.load %arg8[%c0_50, %c126_51] : memref<1x512xf32, #tpu.memory_space<vmem>>, vector<1x256xf32>
    %130 = vector.broadcast %128 : f32 to vector<1x256xf32>
    %131 = arith.mulf %130, %129 : vector<1x256xf32>
    %132 = arith.addf %127, %131 : vector<1x256xf32>
    %133 = arith.addf %123, %132 : vector<1x256xf32>
    %c29 = arith.constant 29 : index
    %134 = memref.load %arg1[%c29] : memref<98xf32, #tpu.memory_space<smem>>
    %c0_52 = arith.constant 0 : index
    %c142 = arith.constant 142 : index
    %135 = vector.load %arg7[%c0_52, %c142] : memref<1x512xf32, #tpu.memory_space<vmem>>, vector<1x256xf32>
    %136 = vector.broadcast %134 : f32 to vector<1x256xf32>
    %137 = arith.mulf %136, %135 : vector<1x256xf32>
    %c78_53 = arith.constant 78 : index
    %138 = memref.load %arg1[%c78_53] : memref<98xf32, #tpu.memory_space<smem>>
    %c0_54 = arith.constant 0 : index
    %c142_55 = arith.constant 142 : index
    %139 = vector.load %arg8[%c0_54, %c142_55] : memref<1x512xf32, #tpu.memory_space<vmem>>, vector<1x256xf32>
    %140 = vector.broadcast %138 : f32 to vector<1x256xf32>
    %141 = arith.mulf %140, %139 : vector<1x256xf32>
    %142 = arith.addf %137, %141 : vector<1x256xf32>
    %143 = arith.addf %133, %142 : vector<1x256xf32>
    %c36 = arith.constant 36 : index
    %144 = memref.load %arg1[%c36] : memref<98xf32, #tpu.memory_space<smem>>
    %c0_56 = arith.constant 0 : index
    %c158 = arith.constant 158 : index
    %145 = vector.load %arg7[%c0_56, %c158] : memref<1x512xf32, #tpu.memory_space<vmem>>, vector<1x256xf32>
    %146 = vector.broadcast %144 : f32 to vector<1x256xf32>
    %147 = arith.mulf %146, %145 : vector<1x256xf32>
    %c85 = arith.constant 85 : index
    %148 = memref.load %arg1[%c85] : memref<98xf32, #tpu.memory_space<smem>>
    %c0_57 = arith.constant 0 : index
    %c158_58 = arith.constant 158 : index
    %149 = vector.load %arg8[%c0_57, %c158_58] : memref<1x512xf32, #tpu.memory_space<vmem>>, vector<1x256xf32>
    %150 = vector.broadcast %148 : f32 to vector<1x256xf32>
    %151 = arith.mulf %150, %149 : vector<1x256xf32>
    %152 = arith.addf %147, %151 : vector<1x256xf32>
    %153 = arith.addf %143, %152 : vector<1x256xf32>
    %c43 = arith.constant 43 : index
    %154 = memref.load %arg1[%c43] : memref<98xf32, #tpu.memory_space<smem>>
    %c0_59 = arith.constant 0 : index
    %c174 = arith.constant 174 : index
    %155 = vector.load %arg7[%c0_59, %c174] : memref<1x512xf32, #tpu.memory_space<vmem>>, vector<1x256xf32>
    %156 = vector.broadcast %154 : f32 to vector<1x256xf32>
    %157 = arith.mulf %156, %155 : vector<1x256xf32>
    %c92 = arith.constant 92 : index
    %158 = memref.load %arg1[%c92] : memref<98xf32, #tpu.memory_space<smem>>
    %c0_60 = arith.constant 0 : index
    %c174_61 = arith.constant 174 : index
    %159 = vector.load %arg8[%c0_60, %c174_61] : memref<1x512xf32, #tpu.memory_space<vmem>>, vector<1x256xf32>
    %160 = vector.broadcast %158 : f32 to vector<1x256xf32>
    %161 = arith.mulf %160, %159 : vector<1x256xf32>
    %162 = arith.addf %157, %161 : vector<1x256xf32>
    %163 = arith.addf %153, %162 : vector<1x256xf32>
    %c1_62 = arith.constant 1 : index
    %c0_63 = arith.constant 0 : index
    %164 = vector.load %arg3[%c1_62, %c0_63] : memref<7x256xf32, #tpu.memory_space<vmem>>, vector<1x256xf32>
    %165 = arith.mulf %164, %163 : vector<1x256xf32>
    %166 = arith.addf %94, %165 : vector<1x256xf32>
    %c2 = arith.constant 2 : index
    %167 = memref.load %arg1[%c2] : memref<98xf32, #tpu.memory_space<smem>>
    %c0_64 = arith.constant 0 : index
    %c79 = arith.constant 79 : index
    %168 = vector.load %arg7[%c0_64, %c79] : memref<1x512xf32, #tpu.memory_space<vmem>>, vector<1x256xf32>
    %169 = vector.broadcast %167 : f32 to vector<1x256xf32>
    %170 = arith.mulf %169, %168 : vector<1x256xf32>
    %c51 = arith.constant 51 : index
    %171 = memref.load %arg1[%c51] : memref<98xf32, #tpu.memory_space<smem>>
    %c0_65 = arith.constant 0 : index
    %c79_66 = arith.constant 79 : index
    %172 = vector.load %arg8[%c0_65, %c79_66] : memref<1x512xf32, #tpu.memory_space<vmem>>, vector<1x256xf32>
    %173 = vector.broadcast %171 : f32 to vector<1x256xf32>
    %174 = arith.mulf %173, %172 : vector<1x256xf32>
    %175 = arith.addf %170, %174 : vector<1x256xf32>
    %c9 = arith.constant 9 : index
    %176 = memref.load %arg1[%c9] : memref<98xf32, #tpu.memory_space<smem>>
    %c0_67 = arith.constant 0 : index
    %c95 = arith.constant 95 : index
    %177 = vector.load %arg7[%c0_67, %c95] : memref<1x512xf32, #tpu.memory_space<vmem>>, vector<1x256xf32>
    %178 = vector.broadcast %176 : f32 to vector<1x256xf32>
    %179 = arith.mulf %178, %177 : vector<1x256xf32>
    %c58 = arith.constant 58 : index
    %180 = memref.load %arg1[%c58] : memref<98xf32, #tpu.memory_space<smem>>
    %c0_68 = arith.constant 0 : index
    %c95_69 = arith.constant 95 : index
    %181 = vector.load %arg8[%c0_68, %c95_69] : memref<1x512xf32, #tpu.memory_space<vmem>>, vector<1x256xf32>
    %182 = vector.broadcast %180 : f32 to vector<1x256xf32>
    %183 = arith.mulf %182, %181 : vector<1x256xf32>
    %184 = arith.addf %179, %183 : vector<1x256xf32>
    %185 = arith.addf %175, %184 : vector<1x256xf32>
    %c16 = arith.constant 16 : index
    %186 = memref.load %arg1[%c16] : memref<98xf32, #tpu.memory_space<smem>>
    %c0_70 = arith.constant 0 : index
    %c111 = arith.constant 111 : index
    %187 = vector.load %arg7[%c0_70, %c111] : memref<1x512xf32, #tpu.memory_space<vmem>>, vector<1x256xf32>
    %188 = vector.broadcast %186 : f32 to vector<1x256xf32>
    %189 = arith.mulf %188, %187 : vector<1x256xf32>
    %c65 = arith.constant 65 : index
    %190 = memref.load %arg1[%c65] : memref<98xf32, #tpu.memory_space<smem>>
    %c0_71 = arith.constant 0 : index
    %c111_72 = arith.constant 111 : index
    %191 = vector.load %arg8[%c0_71, %c111_72] : memref<1x512xf32, #tpu.memory_space<vmem>>, vector<1x256xf32>
    %192 = vector.broadcast %190 : f32 to vector<1x256xf32>
    %193 = arith.mulf %192, %191 : vector<1x256xf32>
    %194 = arith.addf %189, %193 : vector<1x256xf32>
    %195 = arith.addf %185, %194 : vector<1x256xf32>
    %c23 = arith.constant 23 : index
    %196 = memref.load %arg1[%c23] : memref<98xf32, #tpu.memory_space<smem>>
    %c0_73 = arith.constant 0 : index
    %c127 = arith.constant 127 : index
    %197 = vector.load %arg7[%c0_73, %c127] : memref<1x512xf32, #tpu.memory_space<vmem>>, vector<1x256xf32>
    %198 = vector.broadcast %196 : f32 to vector<1x256xf32>
    %199 = arith.mulf %198, %197 : vector<1x256xf32>
    %c72 = arith.constant 72 : index
    %200 = memref.load %arg1[%c72] : memref<98xf32, #tpu.memory_space<smem>>
    %c0_74 = arith.constant 0 : index
    %c127_75 = arith.constant 127 : index
    %201 = vector.load %arg8[%c0_74, %c127_75] : memref<1x512xf32, #tpu.memory_space<vmem>>, vector<1x256xf32>
    %202 = vector.broadcast %200 : f32 to vector<1x256xf32>
    %203 = arith.mulf %202, %201 : vector<1x256xf32>
    %204 = arith.addf %199, %203 : vector<1x256xf32>
    %205 = arith.addf %195, %204 : vector<1x256xf32>
    %c30 = arith.constant 30 : index
    %206 = memref.load %arg1[%c30] : memref<98xf32, #tpu.memory_space<smem>>
    %c0_76 = arith.constant 0 : index
    %c143 = arith.constant 143 : index
    %207 = vector.load %arg7[%c0_76, %c143] : memref<1x512xf32, #tpu.memory_space<vmem>>, vector<1x256xf32>
    %208 = vector.broadcast %206 : f32 to vector<1x256xf32>
    %209 = arith.mulf %208, %207 : vector<1x256xf32>
    %c79_77 = arith.constant 79 : index
    %210 = memref.load %arg1[%c79_77] : memref<98xf32, #tpu.memory_space<smem>>
    %c0_78 = arith.constant 0 : index
    %c143_79 = arith.constant 143 : index
    %211 = vector.load %arg8[%c0_78, %c143_79] : memref<1x512xf32, #tpu.memory_space<vmem>>, vector<1x256xf32>
    %212 = vector.broadcast %210 : f32 to vector<1x256xf32>
    %213 = arith.mulf %212, %211 : vector<1x256xf32>
    %214 = arith.addf %209, %213 : vector<1x256xf32>
    %215 = arith.addf %205, %214 : vector<1x256xf32>
    %c37 = arith.constant 37 : index
    %216 = memref.load %arg1[%c37] : memref<98xf32, #tpu.memory_space<smem>>
    %c0_80 = arith.constant 0 : index
    %c159 = arith.constant 159 : index
    %217 = vector.load %arg7[%c0_80, %c159] : memref<1x512xf32, #tpu.memory_space<vmem>>, vector<1x256xf32>
    %218 = vector.broadcast %216 : f32 to vector<1x256xf32>
    %219 = arith.mulf %218, %217 : vector<1x256xf32>
    %c86 = arith.constant 86 : index
    %220 = memref.load %arg1[%c86] : memref<98xf32, #tpu.memory_space<smem>>
    %c0_81 = arith.constant 0 : index
    %c159_82 = arith.constant 159 : index
    %221 = vector.load %arg8[%c0_81, %c159_82] : memref<1x512xf32, #tpu.memory_space<vmem>>, vector<1x256xf32>
    %222 = vector.broadcast %220 : f32 to vector<1x256xf32>
    %223 = arith.mulf %222, %221 : vector<1x256xf32>
    %224 = arith.addf %219, %223 : vector<1x256xf32>
    %225 = arith.addf %215, %224 : vector<1x256xf32>
    %c44 = arith.constant 44 : index
    %226 = memref.load %arg1[%c44] : memref<98xf32, #tpu.memory_space<smem>>
    %c0_83 = arith.constant 0 : index
    %c175 = arith.constant 175 : index
    %227 = vector.load %arg7[%c0_83, %c175] : memref<1x512xf32, #tpu.memory_space<vmem>>, vector<1x256xf32>
    %228 = vector.broadcast %226 : f32 to vector<1x256xf32>
    %229 = arith.mulf %228, %227 : vector<1x256xf32>
    %c93_84 = arith.constant 93 : index
    %230 = memref.load %arg1[%c93_84] : memref<98xf32, #tpu.memory_space<smem>>
    %c0_85 = arith.constant 0 : index
    %c175_86 = arith.constant 175 : index
    %231 = vector.load %arg8[%c0_85, %c175_86] : memref<1x512xf32, #tpu.memory_space<vmem>>, vector<1x256xf32>
    %232 = vector.broadcast %230 : f32 to vector<1x256xf32>
    %233 = arith.mulf %232, %231 : vector<1x256xf32>
    %234 = arith.addf %229, %233 : vector<1x256xf32>
    %235 = arith.addf %225, %234 : vector<1x256xf32>
    %c2_87 = arith.constant 2 : index
    %c0_88 = arith.constant 0 : index
    %236 = vector.load %arg3[%c2_87, %c0_88] : memref<7x256xf32, #tpu.memory_space<vmem>>, vector<1x256xf32>
    %237 = arith.mulf %236, %235 : vector<1x256xf32>
    %238 = arith.addf %166, %237 : vector<1x256xf32>
    %c3 = arith.constant 3 : index
    %239 = memref.load %arg1[%c3] : memref<98xf32, #tpu.memory_space<smem>>
    %c0_89 = arith.constant 0 : index
    %c80 = arith.constant 80 : index
    %240 = vector.load %arg7[%c0_89, %c80] : memref<1x512xf32, #tpu.memory_space<vmem>>, vector<1x256xf32>
    %241 = vector.broadcast %239 : f32 to vector<1x256xf32>
    %242 = arith.mulf %241, %240 : vector<1x256xf32>
    %c52 = arith.constant 52 : index
    %243 = memref.load %arg1[%c52] : memref<98xf32, #tpu.memory_space<smem>>
    %c0_90 = arith.constant 0 : index
    %c80_91 = arith.constant 80 : index
    %244 = vector.load %arg8[%c0_90, %c80_91] : memref<1x512xf32, #tpu.memory_space<vmem>>, vector<1x256xf32>
    %245 = vector.broadcast %243 : f32 to vector<1x256xf32>
    %246 = arith.mulf %245, %244 : vector<1x256xf32>
    %247 = arith.addf %242, %246 : vector<1x256xf32>
    %c10 = arith.constant 10 : index
    %248 = memref.load %arg1[%c10] : memref<98xf32, #tpu.memory_space<smem>>
    %c0_92 = arith.constant 0 : index
    %c96 = arith.constant 96 : index
    %249 = vector.load %arg7[%c0_92, %c96] : memref<1x512xf32, #tpu.memory_space<vmem>>, vector<1x256xf32>
    %250 = vector.broadcast %248 : f32 to vector<1x256xf32>
    %251 = arith.mulf %250, %249 : vector<1x256xf32>
    %c59 = arith.constant 59 : index
    %252 = memref.load %arg1[%c59] : memref<98xf32, #tpu.memory_space<smem>>
    %c0_93 = arith.constant 0 : index
    %c96_94 = arith.constant 96 : index
    %253 = vector.load %arg8[%c0_93, %c96_94] : memref<1x512xf32, #tpu.memory_space<vmem>>, vector<1x256xf32>
    %254 = vector.broadcast %252 : f32 to vector<1x256xf32>
    %255 = arith.mulf %254, %253 : vector<1x256xf32>
    %256 = arith.addf %251, %255 : vector<1x256xf32>
    %257 = arith.addf %247, %256 : vector<1x256xf32>
    %c17 = arith.constant 17 : index
    %258 = memref.load %arg1[%c17] : memref<98xf32, #tpu.memory_space<smem>>
    %c0_95 = arith.constant 0 : index
    %c112 = arith.constant 112 : index
    %259 = vector.load %arg7[%c0_95, %c112] : memref<1x512xf32, #tpu.memory_space<vmem>>, vector<1x256xf32>
    %260 = vector.broadcast %258 : f32 to vector<1x256xf32>
    %261 = arith.mulf %260, %259 : vector<1x256xf32>
    %c66 = arith.constant 66 : index
    %262 = memref.load %arg1[%c66] : memref<98xf32, #tpu.memory_space<smem>>
    %c0_96 = arith.constant 0 : index
    %c112_97 = arith.constant 112 : index
    %263 = vector.load %arg8[%c0_96, %c112_97] : memref<1x512xf32, #tpu.memory_space<vmem>>, vector<1x256xf32>
    %264 = vector.broadcast %262 : f32 to vector<1x256xf32>
    %265 = arith.mulf %264, %263 : vector<1x256xf32>
    %266 = arith.addf %261, %265 : vector<1x256xf32>
    %267 = arith.addf %257, %266 : vector<1x256xf32>
    %c24 = arith.constant 24 : index
    %268 = memref.load %arg1[%c24] : memref<98xf32, #tpu.memory_space<smem>>
    %c0_98 = arith.constant 0 : index
    %c128_99 = arith.constant 128 : index
    %269 = vector.load %arg7[%c0_98, %c128_99] : memref<1x512xf32, #tpu.memory_space<vmem>>, vector<1x256xf32>
    %270 = vector.broadcast %268 : f32 to vector<1x256xf32>
    %271 = arith.mulf %270, %269 : vector<1x256xf32>
    %c73 = arith.constant 73 : index
    %272 = memref.load %arg1[%c73] : memref<98xf32, #tpu.memory_space<smem>>
    %c0_100 = arith.constant 0 : index
    %c128_101 = arith.constant 128 : index
    %273 = vector.load %arg8[%c0_100, %c128_101] : memref<1x512xf32, #tpu.memory_space<vmem>>, vector<1x256xf32>
    %274 = vector.broadcast %272 : f32 to vector<1x256xf32>
    %275 = arith.mulf %274, %273 : vector<1x256xf32>
    %276 = arith.addf %271, %275 : vector<1x256xf32>
    %277 = arith.addf %267, %276 : vector<1x256xf32>
    %c31 = arith.constant 31 : index
    %278 = memref.load %arg1[%c31] : memref<98xf32, #tpu.memory_space<smem>>
    %c0_102 = arith.constant 0 : index
    %c144 = arith.constant 144 : index
    %279 = vector.load %arg7[%c0_102, %c144] : memref<1x512xf32, #tpu.memory_space<vmem>>, vector<1x256xf32>
    %280 = vector.broadcast %278 : f32 to vector<1x256xf32>
    %281 = arith.mulf %280, %279 : vector<1x256xf32>
    %c80_103 = arith.constant 80 : index
    %282 = memref.load %arg1[%c80_103] : memref<98xf32, #tpu.memory_space<smem>>
    %c0_104 = arith.constant 0 : index
    %c144_105 = arith.constant 144 : index
    %283 = vector.load %arg8[%c0_104, %c144_105] : memref<1x512xf32, #tpu.memory_space<vmem>>, vector<1x256xf32>
    %284 = vector.broadcast %282 : f32 to vector<1x256xf32>
    %285 = arith.mulf %284, %283 : vector<1x256xf32>
    %286 = arith.addf %281, %285 : vector<1x256xf32>
    %287 = arith.addf %277, %286 : vector<1x256xf32>
    %c38 = arith.constant 38 : index
    %288 = memref.load %arg1[%c38] : memref<98xf32, #tpu.memory_space<smem>>
    %c0_106 = arith.constant 0 : index
    %c160 = arith.constant 160 : index
    %289 = vector.load %arg7[%c0_106, %c160] : memref<1x512xf32, #tpu.memory_space<vmem>>, vector<1x256xf32>
    %290 = vector.broadcast %288 : f32 to vector<1x256xf32>
    %291 = arith.mulf %290, %289 : vector<1x256xf32>
    %c87 = arith.constant 87 : index
    %292 = memref.load %arg1[%c87] : memref<98xf32, #tpu.memory_space<smem>>
    %c0_107 = arith.constant 0 : index
    %c160_108 = arith.constant 160 : index
    %293 = vector.load %arg8[%c0_107, %c160_108] : memref<1x512xf32, #tpu.memory_space<vmem>>, vector<1x256xf32>
    %294 = vector.broadcast %292 : f32 to vector<1x256xf32>
    %295 = arith.mulf %294, %293 : vector<1x256xf32>
    %296 = arith.addf %291, %295 : vector<1x256xf32>
    %297 = arith.addf %287, %296 : vector<1x256xf32>
    %c45 = arith.constant 45 : index
    %298 = memref.load %arg1[%c45] : memref<98xf32, #tpu.memory_space<smem>>
    %c0_109 = arith.constant 0 : index
    %c176 = arith.constant 176 : index
    %299 = vector.load %arg7[%c0_109, %c176] : memref<1x512xf32, #tpu.memory_space<vmem>>, vector<1x256xf32>
    %300 = vector.broadcast %298 : f32 to vector<1x256xf32>
    %301 = arith.mulf %300, %299 : vector<1x256xf32>
    %c94_110 = arith.constant 94 : index
    %302 = memref.load %arg1[%c94_110] : memref<98xf32, #tpu.memory_space<smem>>
    %c0_111 = arith.constant 0 : index
    %c176_112 = arith.constant 176 : index
    %303 = vector.load %arg8[%c0_111, %c176_112] : memref<1x512xf32, #tpu.memory_space<vmem>>, vector<1x256xf32>
    %304 = vector.broadcast %302 : f32 to vector<1x256xf32>
    %305 = arith.mulf %304, %303 : vector<1x256xf32>
    %306 = arith.addf %301, %305 : vector<1x256xf32>
    %307 = arith.addf %297, %306 : vector<1x256xf32>
    %c3_113 = arith.constant 3 : index
    %c0_114 = arith.constant 0 : index
    %308 = vector.load %arg3[%c3_113, %c0_114] : memref<7x256xf32, #tpu.memory_space<vmem>>, vector<1x256xf32>
    %309 = arith.mulf %308, %307 : vector<1x256xf32>
    %310 = arith.addf %238, %309 : vector<1x256xf32>
    %c4 = arith.constant 4 : index
    %311 = memref.load %arg1[%c4] : memref<98xf32, #tpu.memory_space<smem>>
    %c0_115 = arith.constant 0 : index
    %c81 = arith.constant 81 : index
    %312 = vector.load %arg7[%c0_115, %c81] : memref<1x512xf32, #tpu.memory_space<vmem>>, vector<1x256xf32>
    %313 = vector.broadcast %311 : f32 to vector<1x256xf32>
    %314 = arith.mulf %313, %312 : vector<1x256xf32>
    %c53 = arith.constant 53 : index
    %315 = memref.load %arg1[%c53] : memref<98xf32, #tpu.memory_space<smem>>
    %c0_116 = arith.constant 0 : index
    %c81_117 = arith.constant 81 : index
    %316 = vector.load %arg8[%c0_116, %c81_117] : memref<1x512xf32, #tpu.memory_space<vmem>>, vector<1x256xf32>
    %317 = vector.broadcast %315 : f32 to vector<1x256xf32>
    %318 = arith.mulf %317, %316 : vector<1x256xf32>
    %319 = arith.addf %314, %318 : vector<1x256xf32>
    %c11 = arith.constant 11 : index
    %320 = memref.load %arg1[%c11] : memref<98xf32, #tpu.memory_space<smem>>
    %c0_118 = arith.constant 0 : index
    %c97 = arith.constant 97 : index
    %321 = vector.load %arg7[%c0_118, %c97] : memref<1x512xf32, #tpu.memory_space<vmem>>, vector<1x256xf32>
    %322 = vector.broadcast %320 : f32 to vector<1x256xf32>
    %323 = arith.mulf %322, %321 : vector<1x256xf32>
    %c60 = arith.constant 60 : index
    %324 = memref.load %arg1[%c60] : memref<98xf32, #tpu.memory_space<smem>>
    %c0_119 = arith.constant 0 : index
    %c97_120 = arith.constant 97 : index
    %325 = vector.load %arg8[%c0_119, %c97_120] : memref<1x512xf32, #tpu.memory_space<vmem>>, vector<1x256xf32>
    %326 = vector.broadcast %324 : f32 to vector<1x256xf32>
    %327 = arith.mulf %326, %325 : vector<1x256xf32>
    %328 = arith.addf %323, %327 : vector<1x256xf32>
    %329 = arith.addf %319, %328 : vector<1x256xf32>
    %c18 = arith.constant 18 : index
    %330 = memref.load %arg1[%c18] : memref<98xf32, #tpu.memory_space<smem>>
    %c0_121 = arith.constant 0 : index
    %c113 = arith.constant 113 : index
    %331 = vector.load %arg7[%c0_121, %c113] : memref<1x512xf32, #tpu.memory_space<vmem>>, vector<1x256xf32>
    %332 = vector.broadcast %330 : f32 to vector<1x256xf32>
    %333 = arith.mulf %332, %331 : vector<1x256xf32>
    %c67 = arith.constant 67 : index
    %334 = memref.load %arg1[%c67] : memref<98xf32, #tpu.memory_space<smem>>
    %c0_122 = arith.constant 0 : index
    %c113_123 = arith.constant 113 : index
    %335 = vector.load %arg8[%c0_122, %c113_123] : memref<1x512xf32, #tpu.memory_space<vmem>>, vector<1x256xf32>
    %336 = vector.broadcast %334 : f32 to vector<1x256xf32>
    %337 = arith.mulf %336, %335 : vector<1x256xf32>
    %338 = arith.addf %333, %337 : vector<1x256xf32>
    %339 = arith.addf %329, %338 : vector<1x256xf32>
    %c25 = arith.constant 25 : index
    %340 = memref.load %arg1[%c25] : memref<98xf32, #tpu.memory_space<smem>>
    %c0_124 = arith.constant 0 : index
    %c129 = arith.constant 129 : index
    %341 = vector.load %arg7[%c0_124, %c129] : memref<1x512xf32, #tpu.memory_space<vmem>>, vector<1x256xf32>
    %342 = vector.broadcast %340 : f32 to vector<1x256xf32>
    %343 = arith.mulf %342, %341 : vector<1x256xf32>
    %c74 = arith.constant 74 : index
    %344 = memref.load %arg1[%c74] : memref<98xf32, #tpu.memory_space<smem>>
    %c0_125 = arith.constant 0 : index
    %c129_126 = arith.constant 129 : index
    %345 = vector.load %arg8[%c0_125, %c129_126] : memref<1x512xf32, #tpu.memory_space<vmem>>, vector<1x256xf32>
    %346 = vector.broadcast %344 : f32 to vector<1x256xf32>
    %347 = arith.mulf %346, %345 : vector<1x256xf32>
    %348 = arith.addf %343, %347 : vector<1x256xf32>
    %349 = arith.addf %339, %348 : vector<1x256xf32>
    %c32 = arith.constant 32 : index
    %350 = memref.load %arg1[%c32] : memref<98xf32, #tpu.memory_space<smem>>
    %c0_127 = arith.constant 0 : index
    %c145 = arith.constant 145 : index
    %351 = vector.load %arg7[%c0_127, %c145] : memref<1x512xf32, #tpu.memory_space<vmem>>, vector<1x256xf32>
    %352 = vector.broadcast %350 : f32 to vector<1x256xf32>
    %353 = arith.mulf %352, %351 : vector<1x256xf32>
    %c81_128 = arith.constant 81 : index
    %354 = memref.load %arg1[%c81_128] : memref<98xf32, #tpu.memory_space<smem>>
    %c0_129 = arith.constant 0 : index
    %c145_130 = arith.constant 145 : index
    %355 = vector.load %arg8[%c0_129, %c145_130] : memref<1x512xf32, #tpu.memory_space<vmem>>, vector<1x256xf32>
    %356 = vector.broadcast %354 : f32 to vector<1x256xf32>
    %357 = arith.mulf %356, %355 : vector<1x256xf32>
    %358 = arith.addf %353, %357 : vector<1x256xf32>
    %359 = arith.addf %349, %358 : vector<1x256xf32>
    %c39 = arith.constant 39 : index
    %360 = memref.load %arg1[%c39] : memref<98xf32, #tpu.memory_space<smem>>
    %c0_131 = arith.constant 0 : index
    %c161 = arith.constant 161 : index
    %361 = vector.load %arg7[%c0_131, %c161] : memref<1x512xf32, #tpu.memory_space<vmem>>, vector<1x256xf32>
    %362 = vector.broadcast %360 : f32 to vector<1x256xf32>
    %363 = arith.mulf %362, %361 : vector<1x256xf32>
    %c88 = arith.constant 88 : index
    %364 = memref.load %arg1[%c88] : memref<98xf32, #tpu.memory_space<smem>>
    %c0_132 = arith.constant 0 : index
    %c161_133 = arith.constant 161 : index
    %365 = vector.load %arg8[%c0_132, %c161_133] : memref<1x512xf32, #tpu.memory_space<vmem>>, vector<1x256xf32>
    %366 = vector.broadcast %364 : f32 to vector<1x256xf32>
    %367 = arith.mulf %366, %365 : vector<1x256xf32>
    %368 = arith.addf %363, %367 : vector<1x256xf32>
    %369 = arith.addf %359, %368 : vector<1x256xf32>
    %c46 = arith.constant 46 : index
    %370 = memref.load %arg1[%c46] : memref<98xf32, #tpu.memory_space<smem>>
    %c0_134 = arith.constant 0 : index
    %c177 = arith.constant 177 : index
    %371 = vector.load %arg7[%c0_134, %c177] : memref<1x512xf32, #tpu.memory_space<vmem>>, vector<1x256xf32>
    %372 = vector.broadcast %370 : f32 to vector<1x256xf32>
    %373 = arith.mulf %372, %371 : vector<1x256xf32>
    %c95_135 = arith.constant 95 : index
    %374 = memref.load %arg1[%c95_135] : memref<98xf32, #tpu.memory_space<smem>>
    %c0_136 = arith.constant 0 : index
    %c177_137 = arith.constant 177 : index
    %375 = vector.load %arg8[%c0_136, %c177_137] : memref<1x512xf32, #tpu.memory_space<vmem>>, vector<1x256xf32>
    %376 = vector.broadcast %374 : f32 to vector<1x256xf32>
    %377 = arith.mulf %376, %375 : vector<1x256xf32>
    %378 = arith.addf %373, %377 : vector<1x256xf32>
    %379 = arith.addf %369, %378 : vector<1x256xf32>
    %c4_138 = arith.constant 4 : index
    %c0_139 = arith.constant 0 : index
    %380 = vector.load %arg3[%c4_138, %c0_139] : memref<7x256xf32, #tpu.memory_space<vmem>>, vector<1x256xf32>
    %381 = arith.mulf %380, %379 : vector<1x256xf32>
    %382 = arith.addf %310, %381 : vector<1x256xf32>
    %c5 = arith.constant 5 : index
    %383 = memref.load %arg1[%c5] : memref<98xf32, #tpu.memory_space<smem>>
    %c0_140 = arith.constant 0 : index
    %c82 = arith.constant 82 : index
    %384 = vector.load %arg7[%c0_140, %c82] : memref<1x512xf32, #tpu.memory_space<vmem>>, vector<1x256xf32>
    %385 = vector.broadcast %383 : f32 to vector<1x256xf32>
    %386 = arith.mulf %385, %384 : vector<1x256xf32>
    %c54 = arith.constant 54 : index
    %387 = memref.load %arg1[%c54] : memref<98xf32, #tpu.memory_space<smem>>
    %c0_141 = arith.constant 0 : index
    %c82_142 = arith.constant 82 : index
    %388 = vector.load %arg8[%c0_141, %c82_142] : memref<1x512xf32, #tpu.memory_space<vmem>>, vector<1x256xf32>
    %389 = vector.broadcast %387 : f32 to vector<1x256xf32>
    %390 = arith.mulf %389, %388 : vector<1x256xf32>
    %391 = arith.addf %386, %390 : vector<1x256xf32>
    %c12 = arith.constant 12 : index
    %392 = memref.load %arg1[%c12] : memref<98xf32, #tpu.memory_space<smem>>
    %c0_143 = arith.constant 0 : index
    %c98 = arith.constant 98 : index
    %393 = vector.load %arg7[%c0_143, %c98] : memref<1x512xf32, #tpu.memory_space<vmem>>, vector<1x256xf32>
    %394 = vector.broadcast %392 : f32 to vector<1x256xf32>
    %395 = arith.mulf %394, %393 : vector<1x256xf32>
    %c61 = arith.constant 61 : index
    %396 = memref.load %arg1[%c61] : memref<98xf32, #tpu.memory_space<smem>>
    %c0_144 = arith.constant 0 : index
    %c98_145 = arith.constant 98 : index
    %397 = vector.load %arg8[%c0_144, %c98_145] : memref<1x512xf32, #tpu.memory_space<vmem>>, vector<1x256xf32>
    %398 = vector.broadcast %396 : f32 to vector<1x256xf32>
    %399 = arith.mulf %398, %397 : vector<1x256xf32>
    %400 = arith.addf %395, %399 : vector<1x256xf32>
    %401 = arith.addf %391, %400 : vector<1x256xf32>
    %c19 = arith.constant 19 : index
    %402 = memref.load %arg1[%c19] : memref<98xf32, #tpu.memory_space<smem>>
    %c0_146 = arith.constant 0 : index
    %c114 = arith.constant 114 : index
    %403 = vector.load %arg7[%c0_146, %c114] : memref<1x512xf32, #tpu.memory_space<vmem>>, vector<1x256xf32>
    %404 = vector.broadcast %402 : f32 to vector<1x256xf32>
    %405 = arith.mulf %404, %403 : vector<1x256xf32>
    %c68 = arith.constant 68 : index
    %406 = memref.load %arg1[%c68] : memref<98xf32, #tpu.memory_space<smem>>
    %c0_147 = arith.constant 0 : index
    %c114_148 = arith.constant 114 : index
    %407 = vector.load %arg8[%c0_147, %c114_148] : memref<1x512xf32, #tpu.memory_space<vmem>>, vector<1x256xf32>
    %408 = vector.broadcast %406 : f32 to vector<1x256xf32>
    %409 = arith.mulf %408, %407 : vector<1x256xf32>
    %410 = arith.addf %405, %409 : vector<1x256xf32>
    %411 = arith.addf %401, %410 : vector<1x256xf32>
    %c26 = arith.constant 26 : index
    %412 = memref.load %arg1[%c26] : memref<98xf32, #tpu.memory_space<smem>>
    %c0_149 = arith.constant 0 : index
    %c130 = arith.constant 130 : index
    %413 = vector.load %arg7[%c0_149, %c130] : memref<1x512xf32, #tpu.memory_space<vmem>>, vector<1x256xf32>
    %414 = vector.broadcast %412 : f32 to vector<1x256xf32>
    %415 = arith.mulf %414, %413 : vector<1x256xf32>
    %c75 = arith.constant 75 : index
    %416 = memref.load %arg1[%c75] : memref<98xf32, #tpu.memory_space<smem>>
    %c0_150 = arith.constant 0 : index
    %c130_151 = arith.constant 130 : index
    %417 = vector.load %arg8[%c0_150, %c130_151] : memref<1x512xf32, #tpu.memory_space<vmem>>, vector<1x256xf32>
    %418 = vector.broadcast %416 : f32 to vector<1x256xf32>
    %419 = arith.mulf %418, %417 : vector<1x256xf32>
    %420 = arith.addf %415, %419 : vector<1x256xf32>
    %421 = arith.addf %411, %420 : vector<1x256xf32>
    %c33 = arith.constant 33 : index
    %422 = memref.load %arg1[%c33] : memref<98xf32, #tpu.memory_space<smem>>
    %c0_152 = arith.constant 0 : index
    %c146 = arith.constant 146 : index
    %423 = vector.load %arg7[%c0_152, %c146] : memref<1x512xf32, #tpu.memory_space<vmem>>, vector<1x256xf32>
    %424 = vector.broadcast %422 : f32 to vector<1x256xf32>
    %425 = arith.mulf %424, %423 : vector<1x256xf32>
    %c82_153 = arith.constant 82 : index
    %426 = memref.load %arg1[%c82_153] : memref<98xf32, #tpu.memory_space<smem>>
    %c0_154 = arith.constant 0 : index
    %c146_155 = arith.constant 146 : index
    %427 = vector.load %arg8[%c0_154, %c146_155] : memref<1x512xf32, #tpu.memory_space<vmem>>, vector<1x256xf32>
    %428 = vector.broadcast %426 : f32 to vector<1x256xf32>
    %429 = arith.mulf %428, %427 : vector<1x256xf32>
    %430 = arith.addf %425, %429 : vector<1x256xf32>
    %431 = arith.addf %421, %430 : vector<1x256xf32>
    %c40 = arith.constant 40 : index
    %432 = memref.load %arg1[%c40] : memref<98xf32, #tpu.memory_space<smem>>
    %c0_156 = arith.constant 0 : index
    %c162 = arith.constant 162 : index
    %433 = vector.load %arg7[%c0_156, %c162] : memref<1x512xf32, #tpu.memory_space<vmem>>, vector<1x256xf32>
    %434 = vector.broadcast %432 : f32 to vector<1x256xf32>
    %435 = arith.mulf %434, %433 : vector<1x256xf32>
    %c89 = arith.constant 89 : index
    %436 = memref.load %arg1[%c89] : memref<98xf32, #tpu.memory_space<smem>>
    %c0_157 = arith.constant 0 : index
    %c162_158 = arith.constant 162 : index
    %437 = vector.load %arg8[%c0_157, %c162_158] : memref<1x512xf32, #tpu.memory_space<vmem>>, vector<1x256xf32>
    %438 = vector.broadcast %436 : f32 to vector<1x256xf32>
    %439 = arith.mulf %438, %437 : vector<1x256xf32>
    %440 = arith.addf %435, %439 : vector<1x256xf32>
    %441 = arith.addf %431, %440 : vector<1x256xf32>
    %c47 = arith.constant 47 : index
    %442 = memref.load %arg1[%c47] : memref<98xf32, #tpu.memory_space<smem>>
    %c0_159 = arith.constant 0 : index
    %c178 = arith.constant 178 : index
    %443 = vector.load %arg7[%c0_159, %c178] : memref<1x512xf32, #tpu.memory_space<vmem>>, vector<1x256xf32>
    %444 = vector.broadcast %442 : f32 to vector<1x256xf32>
    %445 = arith.mulf %444, %443 : vector<1x256xf32>
    %c96_160 = arith.constant 96 : index
    %446 = memref.load %arg1[%c96_160] : memref<98xf32, #tpu.memory_space<smem>>
    %c0_161 = arith.constant 0 : index
    %c178_162 = arith.constant 178 : index
    %447 = vector.load %arg8[%c0_161, %c178_162] : memref<1x512xf32, #tpu.memory_space<vmem>>, vector<1x256xf32>
    %448 = vector.broadcast %446 : f32 to vector<1x256xf32>
    %449 = arith.mulf %448, %447 : vector<1x256xf32>
    %450 = arith.addf %445, %449 : vector<1x256xf32>
    %451 = arith.addf %441, %450 : vector<1x256xf32>
    %c5_163 = arith.constant 5 : index
    %c0_164 = arith.constant 0 : index
    %452 = vector.load %arg3[%c5_163, %c0_164] : memref<7x256xf32, #tpu.memory_space<vmem>>, vector<1x256xf32>
    %453 = arith.mulf %452, %451 : vector<1x256xf32>
    %454 = arith.addf %382, %453 : vector<1x256xf32>
    %c6 = arith.constant 6 : index
    %455 = memref.load %arg1[%c6] : memref<98xf32, #tpu.memory_space<smem>>
    %c0_165 = arith.constant 0 : index
    %c83 = arith.constant 83 : index
    %456 = vector.load %arg7[%c0_165, %c83] : memref<1x512xf32, #tpu.memory_space<vmem>>, vector<1x256xf32>
    %457 = vector.broadcast %455 : f32 to vector<1x256xf32>
    %458 = arith.mulf %457, %456 : vector<1x256xf32>
    %c55 = arith.constant 55 : index
    %459 = memref.load %arg1[%c55] : memref<98xf32, #tpu.memory_space<smem>>
    %c0_166 = arith.constant 0 : index
    %c83_167 = arith.constant 83 : index
    %460 = vector.load %arg8[%c0_166, %c83_167] : memref<1x512xf32, #tpu.memory_space<vmem>>, vector<1x256xf32>
    %461 = vector.broadcast %459 : f32 to vector<1x256xf32>
    %462 = arith.mulf %461, %460 : vector<1x256xf32>
    %463 = arith.addf %458, %462 : vector<1x256xf32>
    %c13 = arith.constant 13 : index
    %464 = memref.load %arg1[%c13] : memref<98xf32, #tpu.memory_space<smem>>
    %c0_168 = arith.constant 0 : index
    %c99 = arith.constant 99 : index
    %465 = vector.load %arg7[%c0_168, %c99] : memref<1x512xf32, #tpu.memory_space<vmem>>, vector<1x256xf32>
    %466 = vector.broadcast %464 : f32 to vector<1x256xf32>
    %467 = arith.mulf %466, %465 : vector<1x256xf32>
    %c62 = arith.constant 62 : index
    %468 = memref.load %arg1[%c62] : memref<98xf32, #tpu.memory_space<smem>>
    %c0_169 = arith.constant 0 : index
    %c99_170 = arith.constant 99 : index
    %469 = vector.load %arg8[%c0_169, %c99_170] : memref<1x512xf32, #tpu.memory_space<vmem>>, vector<1x256xf32>
    %470 = vector.broadcast %468 : f32 to vector<1x256xf32>
    %471 = arith.mulf %470, %469 : vector<1x256xf32>
    %472 = arith.addf %467, %471 : vector<1x256xf32>
    %473 = arith.addf %463, %472 : vector<1x256xf32>
    %c20 = arith.constant 20 : index
    %474 = memref.load %arg1[%c20] : memref<98xf32, #tpu.memory_space<smem>>
    %c0_171 = arith.constant 0 : index
    %c115 = arith.constant 115 : index
    %475 = vector.load %arg7[%c0_171, %c115] : memref<1x512xf32, #tpu.memory_space<vmem>>, vector<1x256xf32>
    %476 = vector.broadcast %474 : f32 to vector<1x256xf32>
    %477 = arith.mulf %476, %475 : vector<1x256xf32>
    %c69 = arith.constant 69 : index
    %478 = memref.load %arg1[%c69] : memref<98xf32, #tpu.memory_space<smem>>
    %c0_172 = arith.constant 0 : index
    %c115_173 = arith.constant 115 : index
    %479 = vector.load %arg8[%c0_172, %c115_173] : memref<1x512xf32, #tpu.memory_space<vmem>>, vector<1x256xf32>
    %480 = vector.broadcast %478 : f32 to vector<1x256xf32>
    %481 = arith.mulf %480, %479 : vector<1x256xf32>
    %482 = arith.addf %477, %481 : vector<1x256xf32>
    %483 = arith.addf %473, %482 : vector<1x256xf32>
    %c27 = arith.constant 27 : index
    %484 = memref.load %arg1[%c27] : memref<98xf32, #tpu.memory_space<smem>>
    %c0_174 = arith.constant 0 : index
    %c131 = arith.constant 131 : index
    %485 = vector.load %arg7[%c0_174, %c131] : memref<1x512xf32, #tpu.memory_space<vmem>>, vector<1x256xf32>
    %486 = vector.broadcast %484 : f32 to vector<1x256xf32>
    %487 = arith.mulf %486, %485 : vector<1x256xf32>
    %c76 = arith.constant 76 : index
    %488 = memref.load %arg1[%c76] : memref<98xf32, #tpu.memory_space<smem>>
    %c0_175 = arith.constant 0 : index
    %c131_176 = arith.constant 131 : index
    %489 = vector.load %arg8[%c0_175, %c131_176] : memref<1x512xf32, #tpu.memory_space<vmem>>, vector<1x256xf32>
    %490 = vector.broadcast %488 : f32 to vector<1x256xf32>
    %491 = arith.mulf %490, %489 : vector<1x256xf32>
    %492 = arith.addf %487, %491 : vector<1x256xf32>
    %493 = arith.addf %483, %492 : vector<1x256xf32>
    %c34 = arith.constant 34 : index
    %494 = memref.load %arg1[%c34] : memref<98xf32, #tpu.memory_space<smem>>
    %c0_177 = arith.constant 0 : index
    %c147 = arith.constant 147 : index
    %495 = vector.load %arg7[%c0_177, %c147] : memref<1x512xf32, #tpu.memory_space<vmem>>, vector<1x256xf32>
    %496 = vector.broadcast %494 : f32 to vector<1x256xf32>
    %497 = arith.mulf %496, %495 : vector<1x256xf32>
    %c83_178 = arith.constant 83 : index
    %498 = memref.load %arg1[%c83_178] : memref<98xf32, #tpu.memory_space<smem>>
    %c0_179 = arith.constant 0 : index
    %c147_180 = arith.constant 147 : index
    %499 = vector.load %arg8[%c0_179, %c147_180] : memref<1x512xf32, #tpu.memory_space<vmem>>, vector<1x256xf32>
    %500 = vector.broadcast %498 : f32 to vector<1x256xf32>
    %501 = arith.mulf %500, %499 : vector<1x256xf32>
    %502 = arith.addf %497, %501 : vector<1x256xf32>
    %503 = arith.addf %493, %502 : vector<1x256xf32>
    %c41 = arith.constant 41 : index
    %504 = memref.load %arg1[%c41] : memref<98xf32, #tpu.memory_space<smem>>
    %c0_181 = arith.constant 0 : index
    %c163 = arith.constant 163 : index
    %505 = vector.load %arg7[%c0_181, %c163] : memref<1x512xf32, #tpu.memory_space<vmem>>, vector<1x256xf32>
    %506 = vector.broadcast %504 : f32 to vector<1x256xf32>
    %507 = arith.mulf %506, %505 : vector<1x256xf32>
    %c90 = arith.constant 90 : index
    %508 = memref.load %arg1[%c90] : memref<98xf32, #tpu.memory_space<smem>>
    %c0_182 = arith.constant 0 : index
    %c163_183 = arith.constant 163 : index
    %509 = vector.load %arg8[%c0_182, %c163_183] : memref<1x512xf32, #tpu.memory_space<vmem>>, vector<1x256xf32>
    %510 = vector.broadcast %508 : f32 to vector<1x256xf32>
    %511 = arith.mulf %510, %509 : vector<1x256xf32>
    %512 = arith.addf %507, %511 : vector<1x256xf32>
    %513 = arith.addf %503, %512 : vector<1x256xf32>
    %c48 = arith.constant 48 : index
    %514 = memref.load %arg1[%c48] : memref<98xf32, #tpu.memory_space<smem>>
    %c0_184 = arith.constant 0 : index
    %c179 = arith.constant 179 : index
    %515 = vector.load %arg7[%c0_184, %c179] : memref<1x512xf32, #tpu.memory_space<vmem>>, vector<1x256xf32>
    %516 = vector.broadcast %514 : f32 to vector<1x256xf32>
    %517 = arith.mulf %516, %515 : vector<1x256xf32>
    %c97_185 = arith.constant 97 : index
    %518 = memref.load %arg1[%c97_185] : memref<98xf32, #tpu.memory_space<smem>>
    %c0_186 = arith.constant 0 : index
    %c179_187 = arith.constant 179 : index
    %519 = vector.load %arg8[%c0_186, %c179_187] : memref<1x512xf32, #tpu.memory_space<vmem>>, vector<1x256xf32>
    %520 = vector.broadcast %518 : f32 to vector<1x256xf32>
    %521 = arith.mulf %520, %519 : vector<1x256xf32>
    %522 = arith.addf %517, %521 : vector<1x256xf32>
    %523 = arith.addf %513, %522 : vector<1x256xf32>
    %c6_188 = arith.constant 6 : index
    %c0_189 = arith.constant 0 : index
    %524 = vector.load %arg3[%c6_188, %c0_189] : memref<7x256xf32, #tpu.memory_space<vmem>>, vector<1x256xf32>
    %525 = arith.mulf %524, %523 : vector<1x256xf32>
    %526 = arith.addf %454, %525 : vector<1x256xf32>
    %527 = arith.negf %526 : vector<1x256xf32>
    %528 = math.exp %527 : vector<1x256xf32>
    %cst_190 = arith.constant 1.000000e+00 : f32
    %529 = vector.broadcast %cst_190 : f32 to vector<1x256xf32>
    %530 = arith.addf %529, %528 : vector<1x256xf32>
    %531 = arith.divf %529, %530 : vector<1x256xf32>
    %c0_191 = arith.constant 0 : index
    %c0_192 = arith.constant 0 : index
    %c0_193 = arith.constant 0 : index
    %532 = vector.load %arg6[%c0_191, %c0_192, %c0_193] : memref<1x1x256xf32, #tpu.memory_space<vmem>>, vector<1x1x256xf32>
    %533 = vector.shape_cast %532 : vector<1x1x256xf32> to vector<1x256xf32>
    %534 = vector.shape_cast %531 : vector<1x256xf32> to vector<1x1x256xf32>
    tpu.vector_store %arg6[%c0_191, %c0_192, %c0_193], %534 {strides = array<i32>} : memref<1x1x256xf32, #tpu.memory_space<vmem>>, vector<1x1x256xf32>,
    %c0_i32_194 = arith.constant 0 : i32
    %535 = arith.index_cast %c0_i32_194 : i32 to index
    %c0_195 = arith.constant 0 : index
    %c0_196 = arith.constant 0 : index
    %536 = vector.load %arg6[%535, %c0_195, %c0_196] : memref<1x1x256xf32, #tpu.memory_space<vmem>>, vector<1x1x256xf32>
    %537 = vector.shape_cast %536 : vector<1x1x256xf32> to vector<1x256xf32>
    %538 = arith.index_cast %c0_i32_194 : i32 to index
    %c0_197 = arith.constant 0 : index
    %c0_198 = arith.constant 0 : index
    %539 = vector.load %arg4[%538, %c0_197, %c0_198] : memref<1x4x256xf32, #tpu.memory_space<vmem>>, vector<1x4x256xf32>
    %540 = vector.shape_cast %539 : vector<1x4x256xf32> to vector<4x256xf32>
    %541 = vector.broadcast %537 : vector<1x256xf32> to vector<4x256xf32>
    %542 = arith.mulf %540, %541 : vector<4x256xf32>
    %543 = arith.index_cast %c0_i32_194 : i32 to index
    %c0_199 = arith.constant 0 : index
    %c0_200 = arith.constant 0 : index
    %544 = vector.load %arg5[%543, %c0_199, %c0_200] : memref<1x4x256xf32, #tpu.memory_space<vmem>>, vector<1x4x256xf32>
    %545 = vector.shape_cast %544 : vector<1x4x256xf32> to vector<4x256xf32>
    %546 = vector.shape_cast %542 : vector<4x256xf32> to vector<1x4x256xf32>
    tpu.vector_store %arg5[%543, %c0_199, %c0_200], %546 {strides = array<i32>} : memref<1x4x256xf32, #tpu.memory_space<vmem>>, vector<1x4x256xf32>,
    %c1_i32_201 = arith.constant 1 : i32
    return
  }
  func.func @transform_0(%arg0: i32) -> i32 {
    %c0_i32 = arith.constant 0 : i32
    %c0_i32_0 = arith.constant 0 : i32
    return %c0_i32 : i32
  }
  func.func @transform_1(%arg0: i32) -> i32 {
    %c0_i32 = arith.constant 0 : i32
    %c0_i32_0 = arith.constant 0 : i32
    return %c0_i32 : i32
  }
  func.func @transform_2(%arg0: i32) -> (i32, i32) {
    %c0_i32 = arith.constant 0 : i32
    %c0_i32_0 = arith.constant 0 : i32
    %c0_i32_1 = arith.constant 0 : i32
    return %c0_i32, %c0_i32_0 : i32, i32
  }
  func.func @transform_3(%arg0: i32) -> (i32, i32, i32) {
    %c0_i32 = arith.constant 0 : i32
    %c0_i32_0 = arith.constant 0 : i32
    %c0_i32_1 = arith.constant 0 : i32
    return %arg0, %c0_i32, %c0_i32_0 : i32, i32, i32
  }
  func.func @transform_4(%arg0: i32) -> (i32, i32, i32) {
    %c0_i32 = arith.constant 0 : i32
    %c0_i32_0 = arith.constant 0 : i32
    %c0_i32_1 = arith.constant 0 : i32
    return %arg0, %c0_i32, %c0_i32_0 : i32, i32, i32
  }
  func.func @transform_5(%arg0: i32) -> (i32, i32, i32) {
    %c0_i32 = arith.constant 0 : i32
    %c0_i32_0 = arith.constant 0 : i32
    %c0_i32_1 = arith.constant 0 : i32
    return %arg0, %c0_i32, %c0_i32_0 : i32, i32, i32
  }
}

</mosaic_0001>

<bundles_post_ra>
// kernel: tpu_custom_call.1
= control target key start
LH: loop header
LB: loop body
LE: loop exit
PB: predicated region body
PF: predicated region fallthrough
CT: control target
= control target key end

     0   :  { %s2578_s0 = inlined_call_operand.vmem [shape: f32[98], index: 0, kind: input, shape index: {}]   ;;  %s2579_s1 = inlined_call_operand.<no memory space> [shape: f32[1], index: 1, kind: input, shape index: {}]   ;;  %s2580_s2 = inlined_call_operand.hbm [shape: f32[7,256], index: 2, kind: input, shape index: {}]   ;;  %s2581_s3 = inlined_call_operand.hbm [shape: f32[2,4,256], index: 3, kind: input, shape index: {}]   ;;  %s2582_s4 = inlined_call_operand.hbm [shape: f32[2,4,256], index: 4, kind: output, shape index: {0}]   ;;  %s2583_s5 = inlined_call_operand.hbm [shape: f32[2,1,256], index: 5, kind: output, shape index: {1}]  }
   0x1   :  { %2605 = sst [smem:[#allocation25_spill]] %s2578_s0 }
   0x2   :  { %2606 = sst [smem:[#allocation26_spill]] %s2580_s2 }
   0x3   :  { %2607 = sst [smem:[#allocation27_spill]] %s2581_s3 }
   0x4   :  { %11 = sst [smem:[#allocation4]] %s2579_s1 }
   0x5   :  { %12 = vsyncpa [#allocation8], 0 }
   0x6   :  { %13 = vsyncpa [#allocation6], 0 }
   0x7   :  { %14 = vsyncpa [#allocation11], 0 }
   0x8   :  { %16 = vsyncpa [#allocation11 + $0x1], 0 }
   0x9   :  { %17 = vsyncpa [#allocation7], 0 }
   0xa   :  { %19 = vsyncpa [#allocation7 + $0x1], 0 }
   0xb   :  { %20 = vsyncpa [#allocation14], 0 }
   0xc   :  { %22 = vsyncpa [#allocation14 + $0x1], 0  ;;  %s1718_s20 = smov 0   ;;  %s1720_s21 = smov 0  }
   0xd   :  { %s1722_s22 = smov 0   ;;  %s1724_s23 = smov 0  }
   0xe LB: > { %2608 = sst [smem:[#allocation20_spill]] %s1656_s21  ;;  %s1739_s1 = sadd.s32 4294967295, %s1664_s23   ;;  %s1664_s23 = sphi %s1724_s23, %s2641_s23   ;;  %s1660_s22 = sphi %s1722_s22, %s2644_s22   ;;  %s1656_s21 = sphi %s1720_s21, %s2643_s21   ;;  %s1652_s20 = sphi %s1718_s20, %s2642_s20  }
   0xf   : > { %2609 = sst [smem:[#allocation21_spill]] %s1660_s22  ;;  %s1271_s24 = sadd.s32 4294967294, %s1664_s23  }
  0x10   : > { %2610 = sst [smem:[#allocation22_spill]] %s1664_s23  ;;  %p111_p0 = scmp.ne.s32.totalorder %s1656_s21, %s1652_s20 }
  0x11   : > { %p2584_p1 = scmp.eq.s32.totalorder %s1739_s1, 0  ;;  %p141_p3 = scmp.eq.s32.totalorder %s1271_s24, 1 }
  0x12   : > { %p1272_p5 = scmp.ge.s32.totalorder %s1664_s23, 1  ;;  %p174_p7 = scmp.lt.s32.totalorder %s1664_s23, 3 }
  0x13   : > { %p1748_p4 = por %p2584_p1, %p111_p0  ;;  %p1753_p6 = por %p141_p3, %p111_p0 }
  0x14   : > { %s2613_s0 = sld [smem:[#allocation25_spill]]  ;;  %p1761_p8 = pnand %p1272_p5, %p174_p7 }
  0x15   : > { %s2611_s25 = scalar_select %p1748_p4, 1, 0 }
  0x16   : > { %s2612_s26 = scalar_select %p1753_p6, 1, 0 }
  0x17   : > { %p1408_p10 = pneg %p1761_p8  ;;  %s1666_s6 = smov [#allocation9]  }
  0x18   : > { %s201_s7 = sshll.u32 %s1666_s6, 4  ;;  %s1777_s9 = sadd.s32 1, %s1664_s23   ;;  %s1774_s7 = int_to_ptr.vmem [resolvable:$true] %s201_s7 }
  0x19   : > { %p1770_p11 = pnand %p1408_p10, %p2584_p1  ;;  %2616 = sst [smem:[#allocation23_spill]] %s1777_s9 }
  0x1a   : > { %s187_s29 = sshll.u32 %s2613_s0, 4  ;;  %s95_s10 = ssub.s32 %s1664_s23, %s1777_s9  ;;  %s188_s29 = int_to_ptr.vmem [resolvable:$true] %s187_s29 }
  0x1b   : > { %s1485_s11 = scalar_lea.vmem %s188_s29, 16  ;;  %p1487_p13 = pneg %p1770_p11 }
  0x1c   : > { %p1486_p12 = scmp.ne.s32.totalorder %s188_s29, %s1485_s11  ;;  %p1493_p5 = scmp.lt.s32.totalorder %s188_s29, %s188_s29 }
  0x1d   : > { %p1494_p7 = scmp.lt.s32.totalorder %s1485_s11, %s1485_s11 }
  0x1e   : > { %p1488_p0 = pnand %p1487_p13, %p1486_p12 }
  0x1f   : > { %p1495_p10 = por %p1494_p7, %p1493_p5 }
  0x20   : > { %p1489_p3 = pneg %p1488_p0 }
  0x22   : > { %p1496_p9 = pnand %p1495_p10, %p1489_p3 }
  0x24   : > { %1499 = shalt.err (!%p1496_p9)
}
  0x25   : > { %s1667_s12 = smov [#allocation5]   ;;  %s2617_s2 = sld [smem:[#allocation26_spill]] }
  0x26   : > { %1411 = dma.vmem_to_smem (!%p1770_p11), %s188_s29, 16, %s1667_s12, [#allocation8]  }
  0x2b   : > { %s1500_s15 = scalar_lea.hbm %s2617_s2, 256 }
  0x2c   : > { %p1501_p1 = scmp.ne.s32.totalorder %s2617_s2, %s1500_s15  ;;  %p1507_p9 = scmp.lt.u32.totalorder %s1500_s15, %s2617_s2 }
  0x2e   : > { %p1503_p12 = pnand %p1501_p1, %p1487_p13 }
  0x30   : > { %p1504_p0 = pneg %p1503_p12 }
  0x32   : > { %p1509_p3 = pnand %p1507_p9, %p1504_p0 }
  0x34   : > { %1512 = shalt.err (!%p1509_p3)
}
  0x35   : > { %s1513_s24 = scalar_lea.vmem %s1774_s7, 256  ;;  %p1521_p2 = scmp.lt.s32.totalorder %s1774_s7, %s1774_s7 }
  0x36   : > { %p1514_p5 = scmp.ne.s32.totalorder %s1774_s7, %s1513_s24  ;;  %p1522_p1 = scmp.lt.s32.totalorder %s1513_s24, %s1513_s24 }
  0x38   : > { %p1516_p7 = pnand %p1514_p5, %p1487_p13  ;;  %p1523_p12 = por %p1522_p1, %p1521_p2 }
  0x3a   : > { %p1517_p10 = pneg %p1516_p7 }
  0x3c   : > { %p1524_p6 = pnand %p1523_p12, %p1517_p10 }
  0x3e   : > { %1527 = shalt.err (!%p1524_p6)
}
  0x3f   : > { %1414 = dma.hbm_to_vmem [thread:$0]  (!%p1770_p11), %s2617_s2, 256, %s1774_s7, [#allocation6]  }
  0x40   : > { %p96_p2 = scmp.eq.s32.totalorder %s95_s10, 0  ;;  %s98_s29 = sadd.s32 1, %s1660_s22 }
  0x41   : > { %p105_p6 = scmp.ne.s32.totalorder %s1660_s22, %s1656_s21  ;;  %p106_p13 = scmp.eq.s32.totalorder %s1664_s23, 0 }
  0x42   : > { %s1821_s6 = scalar_select %p96_p2, %s1660_s22, %s98_s29  }
  0x43   : > { %p107_p0 = por %p106_p13, %p105_p6  ;;  %p2619_p9 = scmp.eq.s32.totalorder %s1739_s1, 1 }
  0x44   : > { %2618 = sst [smem:[#allocation24_spill]] %s1821_s6  ;;  %p1428_p5 = scmp.lt.s32.totalorder %s1664_s23, 2 }
  0x45   : > { %p1825_p3 = por %p2619_p9, %p105_p6  ;;  %s212_s11 = sand.u32 1, %s1660_s22  }
  0x46   : > { %s1276_s12 = sshll.u32 %s212_s11, 3  ;;  %s1391_s13 = sshll.u32 %s1664_s23, 7 }
  0x47   : > { %s2620_s8 = scalar_select %p1825_p3, 1, 0 }
  0x48   : > { %s2621_s3 = sld [smem:[#allocation27_spill]]  ;;  %s216_s10 = scalar_lea.vmem [#allocation10], %s1276_s12 }
  0x49   : > { %s224_s16 = sshll.u32 %s216_s10, 4  ;;  %p1839_p11 = pnand %p1428_p5, %p107_p0  ;;  %s1837_s16 = int_to_ptr.vmem [resolvable:$true] %s224_s16 }
  0x4a   : > { %s213_s18 = scalar_lea.sflag [#allocation11], %s212_s11 }
  0x4b   : > { %p1530_p10 = pneg %p1839_p11 }
  0x4e   : > { %s1835_s7 = scalar_lea.hbm %s2621_s3, %s1391_s13  ;;  %s1533_s28 = scalar_lea.hbm %s2621_s3, 256 }
  0x4f   : > { %s1528_s19 = scalar_lea.hbm %s1835_s7, 128  ;;  %p1534_p2 = scmp.lt.u32.totalorder %s1835_s7, %s2621_s3 }
  0x50   : > { %p1529_p7 = scmp.ne.s32.totalorder %s1835_s7, %s1528_s19  ;;  %p1535_p6 = scmp.lt.u32.totalorder %s1533_s28, %s1528_s19 }
  0x51   : > { %p1537_p0 = scmp.lt.u32.totalorder %s1528_s19, %s1835_s7 }
  0x52   : > { %p1531_p1 = pnand %p1530_p10, %p1529_p7  ;;  %p1536_p13 = por %p1535_p6, %p1534_p2 }
  0x54   : > { %p1532_p12 = pneg %p1531_p1  ;;  %p1538_p9 = por %p1537_p0, %p1536_p13 }
  0x56   : > { %p1539_p5 = pnand %p1538_p9, %p1532_p12 }
  0x58   : > { %1542 = shalt.err (!%p1539_p5)
}
  0x59   : > { %s1543_s11 = scalar_lea.vmem %s1837_s16, 128  ;;  %s1668_s13 = smov [#allocation10]  }
  0x5a   : > { %p1544_p7 = scmp.ne.s32.totalorder %s1837_s16, %s1543_s11  ;;  %s1548_s14 = sshll.u32 %s1668_s13, 4  ;;  %s1549_s14 = int_to_ptr.vmem [resolvable:$false] %s1548_s14 }
  0x5b   : > { %s1550_s15 = scalar_lea.vmem %s1549_s14, 256  ;;  %p1551_p4 = scmp.lt.s32.totalorder %s1837_s16, %s1549_s14 }
  0x5c   : > { %p1546_p1 = pnand %p1544_p7, %p1530_p10  ;;  %p1552_p2 = scmp.lt.s32.totalorder %s1550_s15, %s1543_s11 }
  0x5e   : > { %p1547_p3 = pneg %p1546_p1  ;;  %p1553_p6 = por %p1552_p2, %p1551_p4 }
  0x60   : > { %p1554_p13 = pnand %p1553_p6, %p1547_p3 }
  0x62   : > { %1557 = shalt.err (!%p1554_p13)
}
  0x63   : > { %1418 = dma.hbm_to_vmem [thread:$0]  (!%p1839_p11), %s1835_s7, 128, %s1837_s16, %s213_s18  }
  0x64   : > { %233 = sbr.rel (%p1761_p8) target bundleno = 540 (0x21c), region = 36  ;;  %p2623_p10 = scmp.eq.s32.totalorder (!%p1761_p8), %s1739_s1, 0 }
  0x6b   : > { %1631 = dma.done.wait (%p2623_p10), [#allocation8], 16   ;;  %p2624_p12 = pmov %p2623_p10 }
  0x6c   : > { %p2625_p0 = pmov %p2623_p10 }
  0x6d   : > { %1633 = vsyncadd (%p2624_p12), [#allocation8], 4294967280 }
  0x6e   : > { %1635 = dma.done.wait (%p2625_p0), [#allocation6], 256   ;;  %p2626_p4 = pmov %p2625_p0 }
  0x6f   : > { %s1879_s10 = sand.u32 1, %s1656_s21   ;;  %p2627_p8 = scmp.ne.s32.totalorder %s2611_s25, 0 }
  0x70   : > { %1637 = vsyncadd (%p2626_p4), [#allocation6], 4294967040  ;;  %s2587_s30 = sshll.u32 %s1879_s10, 3  ;;  %s244_s7 = scalar_lea.sflag [#allocation11], %s1879_s10 }
  0x71   : > { %s1885_s16 = scalar_lea.vmem [#allocation10], %s2587_s30 }
  0x72   : > { %1639 = dma.done.wait (%p2627_p8), %s244_s7, 128  }
  0x73   : > { %1641 = vsyncadd (%p2627_p8), %s244_s7, 4294967168 }
  0x74   : > { %252 = sfence }
  0x75   : > { %v280_v0 = vlaneseq  ;;  %v288_v1 = vld [vmem:[%s1885_s16] sm:$0xff]  ;;  %vm292_vm0 = vcmask 1043456   ;;  %v1669_v7 = vmov 0.0   ;;  %v1670_v14 = vmov 1966171168   ;;  %s1895_s25 = sld [smem:[#allocation5 + $0x8]] }
  0x76   : > { %v290_v2 = vcombine.high %v288_v1, %v288_v1  ;;  %v293_v3 = vsel %vm292_vm0, %v288_v1, -inf  ;;  %v307_v4 = vsel %vm292_vm0, %v288_v1, 0.0  ;;  %v327_v15 = vunpack.c.l.s4 %v1670_v14  ;;  %s1897_s17 = sld [smem:[#allocation5 + $0x39]]  ;;  %s1899_s18 = sld [smem:[#allocation5 + $0x7]] }
  0x77   : > { %vm282_vm1 = vcmp.lt.s32.totalorder %v280_v0, 128  ;;  %v294_v5 = vrot.slane %v293_v3, 4  ;;  %v308_v6 = vrot.slane %v307_v4, 4  ;;  %v1892_v25 = vshrl.u32 %v280_v0, 7  ;;  %s1901_s19 = sld [smem:[#allocation5 + $0x38]]  ;;  %s1903_s24 = sld [smem:[#allocation5 + $0x15]] }
  0x78   : > { %284 = vst.msk [vmem:[#allocation2] sm:$0x1] %vm282_vm1, %v1669_v7  ;;  %285 = vst.msk [vmem:[#allocation3] sm:$0x1] %vm282_vm1, %v1669_v7  ;;  %v300_v8 = vsel %vm292_vm0, %v290_v2, -inf  ;;  %v314_v9 = vsel %vm292_vm0, %v290_v2, 0.0  ;;  %v328_v24 = vunpack.c.0.s8 %v327_v15 }
  0x79   : > { %286 = vst.msk [vmem:[#allocation2 + $0x3] sm:$0x1] %vm282_vm1, %v1669_v7  ;;  %287 = vst.msk [vmem:[#allocation3 + $0x3] sm:$0x1] %vm282_vm1, %v1669_v7  ;;  %v295_v10 = vmax.f32 %v293_v3, %v294_v5  ;;  %v301_v11 = vrot.slane %v300_v8, 4  ;;  %v309_v12 = vadd.f32 %v308_v6, %v307_v4  ;;  %v315_v13 = vrot.slane %v314_v9, 4 }
  0x7a   : > { %v331_v36 = vsub.s32 %v328_v24, %v1892_v25  ;;  %s1905_s27 = sld [smem:[#allocation5 + $0x46]]  ;;  %vm1907_vm2 = vcmp.lt.s32.totalorder %v280_v0, 256  ;;  %s1913_s29 = sld [smem:[#allocation5 + $0x3f]]  ;;  %vm385_vm3 = vcmask 916480   ;;  %vm400_vm4 = vcmask 785408  }
  0x7b   : > { %v296_v16 = vrot.slane %v295_v10, 2  ;;  %v302_v17 = vmax.f32 %v300_v8, %v301_v11  ;;  %v310_v18 = vrot.slane %v309_v12, 2  ;;  %v316_v19 = vadd.f32 %v315_v13, %v314_v9  ;;  %s1911_s28 = sld [smem:[#allocation5 + $0xe]]  ;;  %s1915_s12 = sld [smem:[#allocation5 + $0x9]] }
  0x7c   : > { %s1917_s11 = sld [smem:[#allocation5 + $0x3a]]  ;;  %s1919_s13 = sld [smem:[#allocation5 + $0xf]]  ;;  %v484_v44 = vstv %s1895_s25  ;;  %v487_v45 = vstv %s1897_s17  ;;  %v375_v46 = vstv %s1899_s18  ;;  %vm415_vm5 = vcmask 654336  }
  0x7d   : > { %v297_v20 = vmax.f32 %v295_v10, %v296_v16  ;;  %v303_v21 = vrot.slane %v302_v17, 2  ;;  %v311_v22 = vadd.f32 %v310_v18, %v309_v12  ;;  %v317_v23 = vrot.slane %v316_v19, 2  ;;  %s1921_s14 = sld [smem:[#allocation5 + $0x40]]  ;;  %s1927_s15 = sld [smem:[#allocation5 + $0x16]] }
  0x7e   : > { %s1929_s7 = sld [smem:[#allocation5 + $0x47]]  ;;  %v378_v47 = vstv %s1901_s19  ;;  %s1935_s30 = sld [smem:[#allocation5 + $0x1c]]  ;;  %v405_v48 = vstv %s1903_s24  ;;  %vm432_vm6 = vcmask 523264   ;;  %vm447_vm7 = vcmask 392192  }
  0x7f   : > { %v298_v26 = vrot.slane %v297_v20, 1  ;;  %v304_v27 = vmax.f32 %v302_v17, %v303_v21  ;;  %v312_v28 = vrot.slane %v311_v22, 1  ;;  %v318_v29 = vadd.f32 %v317_v23, %v316_v19  ;;  %s1937_s0 = sld [smem:[#allocation5 + $0x4d]]  ;;  %s1951_s25 = sld [smem:[#allocation5 + $0xa]] }
  0x80   : > { %v408_v49 = vstv %s1905_s27  ;;  %v393_v51 = vstv %s1913_s29  ;;  %s1957_s17 = sld [smem:[#allocation5 + $0x3b]]  ;;  %s1963_s18 = sld [smem:[#allocation5 + $0x10]]  ;;  %vm462_vm8 = vcmask 261120   ;;  %vm471_vm9 = vcmask 416768  }
  0x81   : > { %v299_v30 = vmax.f32 %v297_v20, %v298_v26  ;;  %v305_v31 = vrot.slane %v304_v27, 1  ;;  %v313_v32 = vadd.f32 %v312_v28, %v311_v22  ;;  %v319_v33 = vrot.slane %v318_v29, 1  ;;  %s1965_s19 = sld [smem:[#allocation5 + $0x41]]  ;;  %s1967_s24 = sld [smem:[#allocation5 + $0x1d]] }
  0x82   : > { %v390_v50 = vstv %s1911_s28  ;;  %v586_v54 = vstv %s1915_s12  ;;  %v589_v55 = vstv %s1917_s11  ;;  %v498_v56 = vstv %s1919_s13  ;;  %s1972_s27 = sld [smem:[#allocation5 + $0x4e]]  ;;  %s2588_s28 = smov 112  }
  0x83   : > { %v306_v34 = vmax.f32 %v304_v27, %v305_v31  ;;  %v320_v35 = vadd.f32 %v319_v33, %v318_v29  ;;  %v501_v57 = vstv %s1921_s14  ;;  %v512_v7 = vstv %s1927_s15  ;;  %s1979_s29 = sld [smem:[#allocation5 + $0x23]]  ;;  %s1981_s12 = sld [smem:[#allocation5 + $0x54]] }
  0x84   : > { %v515_v11 = vstv %s1929_s7  ;;  %v421_v13 = vstv %s1935_s30  ;;  %s1989_s11 = sld [smem:[#allocation5 + $0x11]]  ;;  %s1991_s13 = sld [smem:[#allocation5 + $0x42]]  ;;  %vm573_vm10 = vcmask 408576   ;;  %vm675_vm11 = vcmask 400384  }
  0x85   : > { %v325_v37 = vcombine.low %v299_v30, %v306_v34  ;;  %v346_v38 = vcombine.low %v313_v32, %v320_v35  ;;  %v425_v15 = vstv %s1937_s0  ;;  %s1993_s14 = sld [smem:[#allocation5 + $0x17]]  ;;  %v688_v19 = vstv %s1951_s25  ;;  %s1998_s15 = sld [smem:[#allocation5 + $0x48]] }
  0x86   : > { %s2000_s30 = sld [smem:[#allocation5 + $0x2a]]  ;;  %s2590_s0 = smov 80   ;;  %v691_v23 = vstv %s1957_s17  ;;  %v600_v24 = vstv %s1963_s18  ;;  %vm880_vm12 = vcmask 384000   ;;  %vm982_vm13 = vcmask 375808  }
  0x87   : > { %v332_v39 = vrot.slane %v325_v37, %v331_v36  ;;  %v353_v40 = vrot.slane %v346_v38, %v331_v36  ;;  %s2592_s7 = smov 96   ;;  %s2009_s25 = sld [smem:[#allocation5 + $0xb]]  ;;  %v603_v26 = vstv %s1965_s19  ;;  %v526_v27 = vstv %s1967_s24 }
  0x88   : > { %s2013_s2 = sld [smem:[#allocation5 + $0x3c]]  ;;  %v529_v31 = vstv %s1972_s27  ;;  %s2630_s17 = smov 112   ;;  %vm1084_vm14 = vcmask 367616  }
  0x89   : > { %v339_v42 = vrot.slane %v332_v39, %v331_v36  ;;  %v360_v43 = vrot.slane %v353_v40, %v331_v36  ;;  %s2020_s3 = sld [smem:[#allocation5 + $0x24]]  ;;  %s2631_s18 = smov 96   ;;  %v437_v35 = vstv %s1979_s29  ;;  %v440_v36 = vstv %s1981_s12 }
  0x8a   : > { %s2030_s19 = sld [smem:[#allocation5 + $0x55]]  ;;  %s2033_s24 = sld [smem:[#allocation5 + $0x12]]  ;;  %v702_v40 = vstv %s1989_s11 }
  0x8b   : > { %343 = vst.msk [vmem:[#allocation2 + $0x1] sm:$0x3] %vm1907_vm2, %v339_v42  ;;  %362 = vst.msk [vmem:[#allocation3 + $0x1] sm:$0x3] %vm1907_vm2, %v360_v43  ;;  %s2037_s27 = sld [smem:[#allocation5 + $0x43]]  ;;  %s2039_s6 = sld [smem:[#allocation5 + $0x18]]  ;;  %v705_v42 = vstv %s1991_s13  ;;  %v614_v43 = vstv %s1993_s14 }
  0x8c   : > { %s2045_s29 = sld [smem:[#allocation5 + $0x49]]  ;;  %s2047_s12 = sld [smem:[#allocation5 + $0x2b]] }
  0x8d   : > { %s2632_s22 = smov 80   ;;  %s2596_s21 = smov 64  }
  0x8e   : > { %s2053_s11 = sld [smem:[#allocation5 + $0x5c]]  ;;  %s2061_s14 = sld [smem:[#allocation5 + $0x3d]] }
  0x8f   : > { %s2059_s13 = sld [smem:[#allocation5 + $0xc]]  ;;  %s2068_s9 = sld [smem:[#allocation5 + $0x50]] }
  0x90   : > { %s2224_s23 = sld [smem:[#allocation5 + $0x3]]  ;;  %p2636_p11 = scmp.ne.s32.totalorder %s2620_s8, 0 }
  0x92   : > { %v1943_v52 = vld [vmem:[#allocation2] sm:$0x7]  ;;  %v1945_v53 = vld [vmem:[#allocation3] sm:$0x7] }
  0x93   : > { %v485_v58 = vmul.f32 %v484_v44, %v1943_v52  ;;  %v488_v59 = vmul.f32 %v487_v45, %v1945_v53  ;;  %v376_v60 = vmul.f32 %v375_v46, %v1943_v52  ;;  %v379_v61 = vmul.f32 %v378_v47, %v1945_v53  ;;  %v1983_v12 = vld [vmem:[#allocation2 + $0x1] sm:$0x7]  ;;  %v1986_v14 = vld [vmem:[#allocation3 + $0x1] sm:$0x7] }
  0x94   : > { %v406_v62 = vmul.f32 %v405_v48, %v1943_v52  ;;  %v409_v63 = vmul.f32 %v408_v49, %v1945_v53  ;;  %v391_v0 = vmul.f32 %v390_v50, %v1943_v52  ;;  %v394_v1 = vmul.f32 %v393_v51, %v1945_v53 }
  0x95   : > { %v489_v2 = vadd.f32 %v488_v59, %v485_v58  ;;  %v380_v3 = vadd.f32 %v379_v61, %v376_v60  ;;  %v587_v5 = vmul.f32 %v586_v54, %v1943_v52  ;;  %v590_v6 = vmul.f32 %v589_v55, %v1945_v53 }
  0x96   : > { %v410_v4 = vadd.f32 %v409_v63, %v406_v62  ;;  %v395_v8 = vadd.f32 %v394_v1, %v391_v0  ;;  %v499_v9 = vmul.f32 %v498_v56, %v1943_v52  ;;  %v502_v10 = vmul.f32 %v501_v57, %v1945_v53 }
  0x97   : > { %491 = vrot.lane.b32.xlu1 %v489_v2, %s2588_s28  ;;  %382 = vrot.lane.b32.xlu0 %v380_v3, %s2588_s28  ;;  %v591_v16 = vadd.f32 %v590_v6, %v587_v5  ;;  %v513_v17 = vmul.f32 %v512_v7, %v1943_v52  ;;  %v516_v18 = vmul.f32 %v515_v11, %v1945_v53  ;;  %s2007_s28 = sld [smem:[#allocation5 + $0x5b]]  ;;  %v617_v47 = vstv %s1998_s15  ;;  %s2085_s15 = sld [smem:[#allocation5 + $0x44]]  ;;  %v716_v11 = vld [vmem:[#allocation2 + $0x1] sm:$0x3] }
  0x98   : > { %v503_v20 = vadd.f32 %v502_v10, %v499_v9  ;;  %v422_v21 = vmul.f32 %v421_v13, %v1983_v12  ;;  %v426_v22 = vmul.f32 %v425_v15, %v1986_v14  ;;  %v689_v29 = vmul.f32 %v688_v19, %v1943_v52  ;;  %v720_v13 = vld [vmem:[#allocation3 + $0x1] sm:$0x3] }
  0x99   : > { %v517_v28 = vadd.f32 %v516_v18, %v513_v17  ;;  %v692_v30 = vmul.f32 %v691_v23, %v1945_v53  ;;  %v601_v33 = vmul.f32 %v600_v24, %v1943_v52  ;;  %v604_v34 = vmul.f32 %v603_v26, %v1945_v53 }
  0x9a   : > { %v427_v32 = vadd.f32 %v426_v22, %v422_v21  ;;  %v527_v37 = vmul.f32 %v526_v27, %v1983_v12  ;;  %v530_v38 = vmul.f32 %v529_v31, %v1986_v14  ;;  %v438_v39 = vmul.f32 %v437_v35, %v1983_v12 }
  0x9b   : > { %412 = vrot.lane.b32.xlu1 %v410_v4, %s2590_s0  ;;  %397 = vrot.lane.b32.xlu0 %v395_v8, %s2592_s7  ;;  %s2015_s0 = sld [smem:[#allocation5 + $0x1e]]  ;;  %s2018_s7 = sld [smem:[#allocation5 + $0x4f]]  ;;  %v693_v44 = vadd.f32 %v692_v30, %v689_v29  ;;  %v605_v45 = vadd.f32 %v604_v34, %v601_v33  ;;  %v441_v46 = vmul.f32 %v440_v36, %v1986_v14  ;;  %v452_v48 = vstv %s2000_s30 }
  0x9c   : > { %v791_v50 = vstv %s2009_s25  ;;  %v794_v51 = vstv %s2013_s2  ;;  %v531_v54 = vadd.f32 %v530_v38, %v527_v37  ;;  %v540_v57 = vstv %s2020_s3  ;;  %s2074_s2 = sld [smem:[#allocation5 + $0x25]]  ;;  %s2083_s3 = sld [smem:[#allocation5 + $0x13]] }
  0x9d   : > { %v455_v49 = vstv %s2007_s28  ;;  %v703_v58 = vmul.f32 %v702_v40, %v1943_v52  ;;  %v706_v59 = vmul.f32 %v705_v42, %v1945_v53  ;;  %v615_v60 = vmul.f32 %v614_v43, %v1943_v52  ;;  %s2076_s28 = sld [smem:[#allocation5 + $0x56]]  ;;  %s2091_s30 = sld [smem:[#allocation5 + $0x19]] }
  0x9e   : > { %v618_v61 = vmul.f32 %v617_v47, %v1945_v53  ;;  %v442_v62 = vadd.f32 %v441_v46, %v438_v39  ;;  %v453_v63 = vmul.f32 %v452_v48, %v1983_v12  ;;  %v456_v0 = vmul.f32 %v455_v49, %v1986_v14  ;;  %s2602_s25 = smov 48  }
  0x9f   : > { %593 = vrot.lane.b32.xlu1 %v591_v16, %s2630_s17  ;;  %505 = vrot.lane.b32.xlu0 %v503_v20, %s2631_s18  ;;  %v543_v1 = vstv %s2030_s19  ;;  %v792_v2 = vmul.f32 %v791_v50, %v1943_v52  ;;  %v795_v3 = vmul.f32 %v794_v51, %v1945_v53  ;;  %v805_v6 = vstv %s2033_s24  ;;  %s2107_s19 = sld [smem:[#allocation5 + $0x5d]] }
  0xa0   : > { %v808_v7 = vstv %s2037_s27  ;;  %v717_v8 = vstv %s2039_s6  ;;  %v707_v9 = vadd.f32 %v706_v59, %v703_v58  ;;  %v619_v10 = vadd.f32 %v618_v61, %v615_v60  ;;  %s2105_s6 = sld [smem:[#allocation5 + $0x2c]]  ;;  %s2113_s24 = sld [smem:[#allocation5 + $0xd]] }
  0xa1   : > { %v628_v55 = vstv %s2015_s0  ;;  %v631_v56 = vstv %s2018_s7  ;;  %s2093_s0 = sld [smem:[#allocation5 + $0x4a]]  ;;  %v721_v15 = vstv %s2045_s29  ;;  %v554_v16 = vstv %s2047_s12  ;;  %s2633_s7 = smov 64  }
  0xa2   : > { %v629_v4 = vmul.f32 %v628_v55, %v1983_v12  ;;  %v632_v5 = vmul.f32 %v631_v56, %v1986_v14  ;;  %v457_v17 = vadd.f32 %v456_v0, %v453_v63  ;;  %v541_v18 = vmul.f32 %v540_v57, %v1983_v12  ;;  %s2115_s27 = sld [smem:[#allocation5 + $0x3e]]  ;;  %s2119_s29 = sld [smem:[#allocation5 + $0x20]] }
  0xa3   : > { %519 = vrot.lane.b32.xlu1 %v517_v28, %s2632_s22  ;;  %429 = vrot.lane.b32.xlu0 %v427_v32, %s2596_s21  ;;  %s2066_s21 = sld [smem:[#allocation5 + $0x1f]]  ;;  %v544_v19 = vmul.f32 %v543_v1, %v1986_v14  ;;  %v557_v20 = vstv %s2053_s11  ;;  %v796_v21 = vadd.f32 %v795_v3, %v792_v2  ;;  %v806_v23 = vmul.f32 %v805_v6, %v1943_v52  ;;  %s2121_s12 = sld [smem:[#allocation5 + $0x51]] }
  0xa4   : > { %v2109_v22 = vadd.f32 %v632_v5, %v629_v4  ;;  %v893_v24 = vstv %s2059_s13  ;;  %v809_v26 = vmul.f32 %v808_v7, %v1945_v53  ;;  %v718_v27 = vmul.f32 %v717_v8, %v716_v11  ;;  %s2132_s11 = sld [smem:[#allocation5 + $0x26]]  ;;  %s2134_s13 = sld [smem:[#allocation5 + $0x57]] }
  0xa5   : > { %v722_v28 = vmul.f32 %v721_v15, %v720_v13  ;;  %v896_v29 = vstv %s2061_s14  ;;  %v735_v31 = vstv %s2068_s9  ;;  %v642_v32 = vstv %s2074_s2  ;;  %s2142_s9 = sld [smem:[#allocation5 + $0x2f]]  ;;  %s2147_s14 = sld [smem:[#allocation5 + $0x60]] }
  0xa6   : > { %v645_v33 = vstv %s2076_s28  ;;  %v545_v34 = vadd.f32 %v544_v19, %v541_v18  ;;  %v555_v35 = vmul.f32 %v554_v16, %v1983_v12  ;;  %v907_v36 = vstv %s2083_s3  ;;  %s2149_s2 = sld [smem:[#allocation5 + $0x22]]  ;;  %s2155_s28 = sld [smem:[#allocation5 + $0x45]] }
  0xa7   : > { %695 = vrot.lane.b32.xlu1 %v693_v44, %s2630_s17  ;;  %607 = vrot.lane.b32.xlu0 %v605_v45, %s2631_s18  ;;  %v910_v37 = vstv %s2085_s15  ;;  %v558_v38 = vmul.f32 %v557_v20, %v1986_v14  ;;  %v894_v39 = vmul.f32 %v893_v24, %v1943_v52  ;;  %v819_v40 = vstv %s2091_s30  ;;  %s2600_s3 = smov 32   ;;  %s2163_s15 = sld [smem:[#allocation5 + $0x53]] }
  0xa8   : > { %v822_v42 = vstv %s2093_s0  ;;  %v810_v43 = vadd.f32 %v809_v26, %v806_v23  ;;  %v897_v44 = vmul.f32 %v896_v29, %v1945_v53  ;;  %v736_v46 = vmul.f32 %v735_v31, %v1986_v14  ;;  %s2165_s30 = sld [smem:[#allocation5 + $0x30]]  ;;  %s2169_s0 = sld [smem:[#allocation5 + $0x61]] }
  0xa9   : > { %v732_v30 = vstv %s2066_s21  ;;  %s2140_s21 = sld [smem:[#allocation5 + $0x14]]  ;;  %v643_v47 = vmul.f32 %v642_v32, %v1983_v12  ;;  %v646_v48 = vmul.f32 %v645_v33, %v1986_v14  ;;  %v908_v49 = vmul.f32 %v907_v36, %v1943_v52 }
  0xaa   : > { %v733_v45 = vmul.f32 %v732_v30, %v1983_v12  ;;  %v911_v50 = vmul.f32 %v910_v37, %v1945_v53  ;;  %v820_v51 = vmul.f32 %v819_v40, %v1983_v12  ;;  %v656_v55 = vstv %s2105_s6  ;;  %s2177_s6 = sld [smem:[#allocation5 + $0x5a]] }
  0xab   : > { %533 = vrot.lane.b32.xlu1 %v531_v54, %s2633_s7  ;;  %444 = vrot.lane.b32.xlu0 %v442_v62, %s2602_s25  ;;  %v823_v54 = vmul.f32 %v822_v42, %v1986_v14  ;;  %v659_v56 = vstv %s2107_s19  ;;  %v723_v57 = vadd.f32 %v722_v28, %v718_v27  ;;  %v559_v58 = vadd.f32 %v558_v38, %v555_v35  ;;  %s2179_s19 = sld [smem:[#allocation5 + $0x1]] }
  0xac   : > { %v995_v59 = vstv %s2113_s24  ;;  %v998_v60 = vstv %s2115_s27  ;;  %v898_v61 = vadd.f32 %v897_v44, %v894_v39  ;;  %v2173_v62 = vadd.f32 %v736_v46, %v733_v45  ;;  %s2191_s24 = sld [smem:[#allocation5 + $0x32]]  ;;  %s2204_s27 = sld [smem:[#allocation5]] }
  0xad   : > { %v833_v63 = vstv %s2119_s29  ;;  %v836_v0 = vstv %s2121_s12  ;;  %v2181_v1 = vadd.f32 %v646_v48, %v643_v47  ;;  %v2183_v2 = vadd.f32 %v911_v50, %v908_v49  ;;  %s2214_s29 = sld [smem:[#allocation5 + $0x31]]  ;;  %s2216_s12 = sld [smem:[#allocation5 + $0x2]] }
  0xae   : > { %v2186_v3 = vmul.f32 %v656_v55, %v1983_v12  ;;  %v2189_v4 = vmul.f32 %v659_v56, %v1986_v14  ;;  %v2196_v5 = vadd.f32 %v823_v54, %v820_v51  ;;  %v2199_v6 = vmul.f32 %v995_v59, %v1943_v52 }
  0xaf   : > { %709 = vrot.lane.b32.xlu1 %v707_v9, %s2631_s18  ;;  %621 = vrot.lane.b32.xlu0 %v619_v10, %s2632_s22  ;;  %v2202_v7 = vmul.f32 %v998_v60, %v1945_v53  ;;  %v2207_v8 = vmul.f32 %v833_v63, %v1983_v12  ;;  %v2210_v9 = vmul.f32 %v836_v0, %v1986_v14  ;;  %v746_v10 = vstv %s2132_s11  ;;  %s2230_s11 = sld [smem:[#allocation5 + $0x34]] }
  0xb0   : > { %v749_v11 = vstv %s2134_s13  ;;  %v1009_v13 = vstv %s2140_s21  ;;  %v963_v15 = vstv %s2142_s9  ;;  %v966_v16 = vstv %s2147_s14  ;;  %s2232_s13 = sld [smem:[#allocation5 + $0x4]]  ;;  %s2244_s9 = sld [smem:[#allocation5 + $0x35]] }
  0xb1   : > { %v1012_v18 = vstv %s2155_s28  ;;  %v964_v19 = vmul.f32 %v963_v15, %v1983_v12  ;;  %v967_v20 = vmul.f32 %v966_v16, %v1986_v14  ;;  %v2240_v23 = vmul.f32 %v749_v11, %v1986_v14  ;;  %s2251_s14 = sld [smem:[#allocation5 + $0x5]]  ;;  %s2365_s21 = sld [smem:[#allocation5 + $0x28]] }
  0xb2   : > { %v1040_v24 = vstv %s2163_s15  ;;  %v1065_v26 = vstv %s2165_s30  ;;  %v1068_v30 = vstv %s2169_s0  ;;  %v1054_v33 = vstv %s2177_s6  ;;  %s2259_s15 = sld [smem:[#allocation5 + $0x6]]  ;;  %s2266_s30 = sld [smem:[#allocation5 + $0x37]] }
  0xb3   : > { %459 = vrot.lane.b32.xlu1 %v457_v17, %s2600_s3  ;;  %798 = vrot.lane.b32.xlu0 %v796_v21, %s2630_s17  ;;  %s2171_s3 = sld [smem:[#allocation5 + $0x29]]  ;;  %v1037_v17 = vstv %s2149_s2  ;;  %v2246_v27 = vadd.f32 %v967_v20, %v964_v19  ;;  %v1041_v28 = vmul.f32 %v1040_v24, %v1986_v14  ;;  %v1066_v29 = vmul.f32 %v1065_v26, %v1983_v12  ;;  %s2257_s2 = sld [smem:[#allocation5 + $0x36]] }
  0xb4   : > { %v1038_v21 = vmul.f32 %v1037_v17, %v1983_v12  ;;  %v1069_v31 = vmul.f32 %v1068_v30, %v1986_v14  ;;  %v1055_v37 = vmul.f32 %v1054_v33, %v1986_v14  ;;  %v480_v38 = vstv %s2191_s24  ;;  %s2634_s0 = smov 32   ;;  %s2277_s6 = sld [smem:[#allocation5 + $0x4b]] }
  0xb5   : > { %v481_v40 = vmul.f32 %v480_v38, %v1945_v53  ;;  %v371_v45 = vstv %s2214_s29  ;;  %v579_v47 = vstv %s2216_s12  ;;  %v681_v55 = vstv %s2224_s23  ;;  %s2635_s24 = smov 48   ;;  %s2301_s29 = sld [smem:[#allocation5 + $0x2d]] }
  0xb6   : > { %v2261_v35 = vadd.f32 %v1041_v28, %v1038_v21  ;;  %v2270_v39 = vadd.f32 %v1069_v31, %v1066_v29  ;;  %v372_v49 = vmul.f32 %v371_v45, %v1945_v53  ;;  %v580_v50 = vmul.f32 %v579_v47, %v1943_v52  ;;  %s2308_s23 = sld [smem:[#allocation5 + $0x5e]]  ;;  %s2322_s12 = sld [smem:[#allocation5 + $0x4c]] }
  0xb7   : > { %635 = vrot.lane.b32.xlu1 %v2109_v22, %s2633_s7  ;;  %547 = vrot.lane.b32.xlu0 %v545_v34, %s2602_s25  ;;  %s2222_s25 = sld [smem:[#allocation5 + $0x33]]  ;;  %v2237_v22 = vmul.f32 %v746_v10, %v1983_v12  ;;  %v477_v34 = vstv %s2179_s19  ;;  %s2289_s19 = sld [smem:[#allocation5 + $0x27]]  ;;  %v684_v56 = vstv %s2230_s11  ;;  %v682_v59 = vmul.f32 %v681_v55, %v1943_v52 }
  0xb8   : > { %v478_v42 = vmul.f32 %v477_v34, %v1943_v52  ;;  %v685_v60 = vmul.f32 %v684_v56, %v1945_v53  ;;  %v988_v16 = vstv %s2259_s15  ;;  %v991_v21 = vstv %s2266_s30  ;;  %s2337_s11 = sld [smem:[#allocation5 + $0x21]]  ;;  %s1682_s15 = smov 45  }
  0xb9   : > { %v1051_v32 = vstv %s2171_s3  ;;  %s2275_s3 = sld [smem:[#allocation5 + $0x1a]]  ;;  %v889_v15 = vstv %s2257_s2  ;;  %v989_v20 = vmul.f32 %v988_v16, %v1943_v52  ;;  %v661_v24 = vadd.f32 %v2189_v4, %v2186_v3  ;;  %s2367_s28 = sld [smem:[#allocation5 + $0x59]] }
  0xba   : > { %v1052_v36 = vmul.f32 %v1051_v32, %v1983_v12  ;;  %v2284_v48 = vadd.f32 %v481_v40, %v478_v42  ;;  %v2315_v10 = vadd.f32 %v685_v60, %v682_v59  ;;  %v890_v19 = vmul.f32 %v889_v15, %v1945_v53  ;;  %s1681_s2 = smov 46   ;;  %s363_s30 = sld [smem:[#allocation4]] }
  0xbb   : > { %812 = vrot.lane.b32.xlu1 %v810_v43, %s2631_s18  ;;  %725 = vrot.lane.b32.xlu0 %v723_v57, %s2632_s22  ;;  %v367_v43 = vstv %s2204_s27  ;;  %v784_v57 = vstv %s2232_s13  ;;  %s2299_s27 = sld [smem:[#allocation5 + $0x58]]  ;;  %v1000_v26 = vadd.f32 %v2202_v7, %v2199_v6  ;;  %s2339_s13 = sld [smem:[#allocation5 + $0x52]]  ;;  %v992_v28 = vmul.f32 %v991_v21, %v1945_v53 }
  0xbc   : > { %v2279_v44 = vadd.f32 %v1055_v37, %v1052_v36  ;;  %v368_v46 = vmul.f32 %v367_v43, %v1943_v52  ;;  %v924_v30 = vstv %s2277_s6  ;;  %v1013_v3 = vmul.f32 %v1012_v18, %v1945_v53 }
  0xbd   : > { %v582_v51 = vstv %s2222_s25  ;;  %s2320_s25 = sld [smem:[#allocation5 + $0x1b]]  ;;  %v2352_v4 = vadd.f32 %v992_v28, %v989_v20  ;;  %v838_v6 = vadd.f32 %v2210_v9, %v2207_v8  ;;  %v751_v7 = vadd.f32 %v2240_v23, %v2237_v22 }
  0xbe   : > { %v583_v54 = vmul.f32 %v582_v51, %v1945_v53  ;;  %v847_v31 = vstv %s2289_s19  ;;  %v760_v18 = vstv %s2301_s29  ;;  %v763_v8 = vstv %s2308_s23  ;;  %s1117_s23 = scalar_lea.sflag [#allocation14], %s1879_s10 }
  0xbf   : > { %561 = vrot.lane.b32.xlu1 %v559_v58, %s2634_s0  ;;  %900 = vrot.lane.b32.xlu0 %v898_v61, %s2630_s17  ;;  %v2303_v58 = vadd.f32 %v372_v49, %v368_v46  ;;  %v787_v61 = vstv %s2244_s9  ;;  %v921_v29 = vstv %s2275_s3  ;;  %s2370_s9 = sld [smem:[#allocation5 + $0x2e]]  ;;  %v848_v22 = vmul.f32 %v847_v31, %v1983_v12  ;;  %s1393_s3 = sshll.u32 %s1739_s1, 5 }
  0xc0   : > { %v2310_v63 = vadd.f32 %v583_v54, %v580_v50  ;;  %v788_v0 = vmul.f32 %v787_v61, %v1945_v53  ;;  %v761_v32 = vmul.f32 %v760_v18, %v1983_v12  ;;  %v1026_v34 = vstv %s2322_s12  ;;  %s2495_s29 = scalar_lea.hbm %s2583_s5, %s1393_s3  ;;  %s1683_s12 = smov [#allocation13]  }
  0xc1   : > { %v850_v53 = vstv %s2299_s27  ;;  %v764_v37 = vmul.f32 %v763_v8, %v1986_v14  ;;  %v935_v38 = vstv %s2337_s11  ;;  %v938_v40 = vstv %s2339_s13  ;;  %s1562_s11 = sshll.u32 %s1683_s12, 4  ;;  %s1563_s11 = int_to_ptr.vmem [resolvable:$false] %s1562_s11 }
  0xc2   : > { %v851_v23 = vmul.f32 %v850_v53, %v1986_v14  ;;  %v1027_v43 = vmul.f32 %v1026_v34, %v1986_v14  ;;  %v936_v45 = vmul.f32 %v935_v38, %v1983_v12  ;;  %v939_v46 = vmul.f32 %v938_v40, %v1986_v14  ;;  %s1564_s13 = scalar_lea.vmem %s1563_s11, 64 }
  0xc3   : > { %739 = vrot.lane.b32.xlu1 %v2173_v62, %s2633_s7  ;;  %649 = vrot.lane.b32.xlu0 %v2181_v1, %s2635_s24  ;;  %v785_v62 = vmul.f32 %v784_v57, %v1943_v52  ;;  %v886_v1 = vstv %s2251_s14  ;;  %s2372_s14 = sld [smem:[#allocation5 + $0x5f]]  ;;  %v1023_v33 = vstv %s2320_s25  ;;  %v765_v49 = vadd.f32 %v764_v37, %v761_v32 }
  0xc4   : > { %v887_v11 = vmul.f32 %v886_v1, %v1943_v52  ;;  %v1024_v42 = vmul.f32 %v1023_v33, %v1983_v12  ;;  %v852_v47 = vadd.f32 %v851_v23, %v848_v22  ;;  %v949_v50 = vstv %s2365_s21 }
  0xc5   : > { %v2324_v17 = vadd.f32 %v788_v0, %v785_v62  ;;  %v952_v51 = vstv %s2367_s28  ;;  %v861_v54 = vstv %s2370_s9  ;;  %v940_v57 = vadd.f32 %v939_v46, %v936_v45 }
  0xc6   : > { %v1028_v56 = vadd.f32 %v1027_v43, %v1024_v42  ;;  %v950_v59 = vmul.f32 %v949_v50, %v1983_v12  ;;  %v953_v60 = vmul.f32 %v952_v51, %v1986_v14  ;;  %v862_v61 = vmul.f32 %v861_v54, %v1983_v12 }
  0xc7   : > { %914 = vrot.lane.b32.xlu1 %v2183_v2, %s2631_s18  ;;  %826 = vrot.lane.b32.xlu0 %v2196_v5, %s2632_s22  ;;  %v2344_v2 = vadd.f32 %v890_v19, %v887_v11  ;;  %v1010_v5 = vmul.f32 %v1009_v13, %v1943_v52  ;;  %v922_v52 = vmul.f32 %v921_v29, %v1983_v12 }
  0xc8   : > { %v925_v13 = vmul.f32 %v924_v30, %v1986_v14  ;;  %v954_v0 = vadd.f32 %v953_v60, %v950_v59 }
  0xc9   : > { %v1014_v9 = vadd.f32 %v1013_v3, %v1010_v5  ;;  %v864_v55 = vstv %s2372_s14 }
  0xca   : > { %v926_v36 = vadd.f32 %v925_v13, %v922_v52  ;;  %v865_v62 = vmul.f32 %v864_v55, %v1986_v14 }
  0xcb   : > { %663 = vrot.lane.b32.xlu1 %v661_v24, %s2634_s0  ;;  %1002 = vrot.lane.b32.xlu0 %v1000_v26, %s2630_s17  ;;  %s1678_s17 = smov 50  }
  0xcc   : > { %v866_v1 = vadd.f32 %v865_v62, %v862_v61 }
  0xcf   : > { %840 = vrot.lane.b32.xlu1 %v838_v6, %s2633_s7  ;;  %753 = vrot.lane.b32.xlu0 %v751_v7, %s2635_s24 }
  0xd3   : > { %1016 = vrot.lane.b32.xlu1 %v1014_v9, %s2631_s18  ;;  %928 = vrot.lane.b32.xlu0 %v926_v36, %s2632_s22  ;;  %s1679_s18 = smov 49  }
  0xd7   : > { %854 = vrot.lane.b32.xlu1 %v852_v47, %s2635_s24  ;;  %767 = vrot.lane.b32.xlu0 %v765_v49, %s2634_s0 }
  0xdb   : > { %1030 = vrot.lane.b32.xlu1 %v1028_v56, %s2632_s22  ;;  %942 = vrot.lane.b32.xlu0 %v940_v57, %s2633_s7  ;;  %s1677_s22 = smov 51  }
  0xdf   : > { %956 = vrot.lane.b32.xlu1 %v954_v0, %s2635_s24  ;;  %868 = vrot.lane.b32.xlu0 %v866_v1, %s2634_s0 }
  0xe3   : > { %970 = vrot.lane.b32.xlu1 %v2246_v27, %s2634_s0  ;;  %1044 = vrot.lane.b32.xlu0 %v2261_v35, %s2633_s7  ;;  %s1680_s7 = smov 47  }
  0xe7   : > { %1072 = vrot.lane.b32.xlu1 %v2270_v39, %s2634_s0  ;;  %1058 = vrot.lane.b32.xlu0 %v2279_v44, %s2635_s24  ;;  %s1284_s0 = sshll.u32 %s1879_s10, 1 }
  0xe8   : > { %s2489_s6 = scalar_lea.vmem [#allocation13], %s1284_s0 }
  0xe9   : > { %s1145_s19 = sshll.u32 %s2489_s6, 4  ;;  %s2497_s19 = int_to_ptr.vmem [resolvable:$true] %s1145_s19 }
  0xea   : > { %s1558_s25 = scalar_lea.vmem %s2497_s19, 32  ;;  %p1565_p7 = scmp.lt.s32.totalorder %s2497_s19, %s1563_s11 }
  0xeb   : > { %p1559_p3 = scmp.ne.s32.totalorder %s2497_s19, %s1558_s25  ;;  %p1566_p1 = scmp.lt.s32.totalorder %s1564_s13, %s1558_s25 }
  0xed   : > { %p1560_p9 = pnand %p1559_p3, %p2636_p11  ;;  %p1567_p2 = por %p1566_p1, %p1565_p7 }
  0xef   : > { %p1561_p5 = pneg %p1560_p9 }
  0xf1   : > { %p1568_p6 = pnand %p1567_p2, %p1561_p5 }
 0x109   : > { %v492_v12 = vpop.permute.xlu1 %491  ;;  %v383_v14 = vpop.permute.xlu0 %382 }
 0x10a   : > { %v384_v24 = vrot.slane %v383_v14, 1  ;;  %v493_v8 = vrot.slane %v492_v12, 1 }
 0x10c   : > { %v386_v39 = vsel %vm385_vm3, %v383_v14, %v384_v24  ;;  %v494_v36 = vsel %vm385_vm3, %v492_v12, %v493_v8 }
 0x10d   : > { %v413_v11 = vpop.permute.xlu1 %412  ;;  %v398_v15 = vpop.permute.xlu0 %397  ;;  %v388_v28 = vadd.f32 %v386_v39, %v2303_v58  ;;  %v496_v47 = vadd.f32 %v494_v36, %v2284_v48 }
 0x10e   : > { %v399_v27 = vrot.slane %v398_v15, 1  ;;  %v414_v5 = vrot.slane %v413_v11, 1 }
 0x110   : > { %v401_v44 = vsel %vm400_vm4, %v398_v15, %v399_v27  ;;  %v416_v13 = vsel %vm415_vm5, %v413_v11, %v414_v5 }
 0x111   : > { %v2412_v16 = vpop.permute.xlu1 %593  ;;  %v506_v19 = vpop.permute.xlu0 %505  ;;  %v403_v6 = vadd.f32 %v401_v44, %v388_v28 }
 0x112   : > { %v507_v32 = vrot.slane %v506_v19, 1  ;;  %v595_v59 = vrot.slane %v2412_v16, 1 }
 0x113   : > { %v418_v18 = vadd.f32 %v416_v13, %v403_v6 }
 0x114   : > { %v508_v45 = vsel %vm400_vm4, %v506_v19, %v507_v32  ;;  %v596_v14 = vsel %vm385_vm3, %v2412_v16, %v595_v59 }
 0x115   : > { %v520_v20 = vpop.permute.xlu1 %519  ;;  %v430_v21 = vpop.permute.xlu0 %429  ;;  %v510_v51 = vadd.f32 %v508_v45, %v496_v47  ;;  %v598_v39 = vadd.f32 %v596_v14, %v2310_v63 }
 0x116   : > { %v431_v3 = vrot.slane %v430_v21, 7  ;;  %v521_v37 = vrot.slane %v520_v20, 1 }
 0x118   : > { %v433_v53 = vsel %vm432_vm6, %v431_v3, %v430_v21  ;;  %v522_v49 = vsel %vm415_vm5, %v520_v20, %v521_v37 }
 0x119   : > { %v2414_v35 = vpop.permute.xlu1 %695  ;;  %v608_v26 = vpop.permute.xlu0 %607  ;;  %v435_v9 = vadd.f32 %v433_v53, %v418_v18  ;;  %v524_v57 = vadd.f32 %v522_v49, %v510_v51 }
 0x11a   : > { %v609_v48 = vrot.slane %v608_v26, 1  ;;  %v697_v6 = vrot.slane %v2414_v35, 1 }
 0x11c   : > { %v610_v24 = vsel %vm400_vm4, %v608_v26, %v609_v48 }
 0x11d   : > { %v534_v29 = vpop.permute.xlu1 %533  ;;  %v445_v30 = vpop.permute.xlu0 %444 }
 0x11e   : > { %v446_v7 = vrot.slane %v445_v30, 7  ;;  %v535_v46 = vrot.slane %v534_v29, 7 }
 0x120   : > { %v448_v58 = vsel %vm447_vm7, %v446_v7, %v445_v30  ;;  %v536_v56 = vsel %vm432_vm6, %v535_v46, %v534_v29  ;;  %v612_v29 = vadd.f32 %v610_v24, %v598_v39 }
 0x121   : > { %v2419_v31 = vpop.permute.xlu1 %709  ;;  %v622_v52 = vpop.permute.xlu0 %621  ;;  %v450_v34 = vadd.f32 %v448_v58, %v435_v9  ;;  %v538_v61 = vadd.f32 %v536_v56, %v524_v57 }
 0x122   : > { %v623_v11 = vrot.slane %v622_v52, 1  ;;  %v711_v63 = vrot.slane %v2419_v31, 1 }
 0x124   : > { %v624_v44 = vsel %vm415_vm5, %v622_v52, %v623_v11  ;;  %v698_v52 = vsel %vm385_vm3, %v2414_v35, %v697_v6 }
 0x125   : > { %v460_v22 = vpop.permute.xlu1 %459  ;;  %v2424_v23 = vpop.permute.xlu0 %798  ;;  %v626_v3 = vadd.f32 %v624_v44, %v612_v29  ;;  %v700_v37 = vadd.f32 %v698_v52, %v2315_v10 }
 0x126   : > { %v461_v33 = vrot.slane %v460_v22, 7 }
 0x128   : > { %v463_v38 = vsel %vm462_vm8, %v461_v33, %v460_v22 }
 0x129   : > { %v465_v40 = vadd.f32 %v463_v38, %v450_v34  ;;  %v636_v42 = vpop.permute.xlu1 %635  ;;  %v548_v43 = vpop.permute.xlu0 %547  ;;  %v712_v34 = vsel %vm400_vm4, %v2419_v31, %v711_v63  ;;  %v800_v38 = vrot.slane %v2424_v23, 1 }
 0x12a   : > { %v549_v50 = vrot.slane %v548_v43, 7  ;;  %v637_v27 = vrot.slane %v636_v42, 7  ;;  %v714_v35 = vadd.f32 %v712_v34, %v700_v37 }
 0x12b   : > { %468 = vrot.lane.b32.xlu0 %v465_v40, %s1677_s22  ;;  %v801_v10 = vsel %vm385_vm3, %v2424_v23, %v800_v38 }
 0x12c   : > { %v550_v60 = vsel %vm447_vm7, %v549_v50, %v548_v43  ;;  %v638_v16 = vsel %vm432_vm6, %v637_v27, %v636_v42  ;;  %v803_v48 = vadd.f32 %v801_v10, %v2324_v17 }
 0x12d   : > { %v2431_v54 = vpop.permute.xlu1 %812  ;;  %v726_v55 = vpop.permute.xlu0 %725  ;;  %v552_v12 = vadd.f32 %v550_v60, %v538_v61  ;;  %v640_v13 = vadd.f32 %v638_v16, %v626_v3 }
 0x12e   : > { %v727_v58 = vrot.slane %v726_v55, 7  ;;  %v814_v46 = vrot.slane %v2431_v54, 1 }
 0x130   : > { %v728_v40 = vsel %vm415_vm5, %v727_v58, %v726_v55  ;;  %v815_v59 = vsel %vm400_vm4, %v2431_v54, %v814_v46 }
 0x131   : > { %v562_v62 = vpop.permute.xlu1 %561  ;;  %v2436_v0 = vpop.permute.xlu0 %900  ;;  %v730_v49 = vadd.f32 %v728_v40, %v714_v35 }
 0x132   : > { %v563_v1 = vrot.slane %v562_v62, 7  ;;  %v902_v31 = vrot.slane %v2436_v0, 1 }
 0x134   : > { %v564_v15 = vsel %vm462_vm8, %v563_v1, %v562_v62  ;;  %v903_v1 = vsel %vm385_vm3, %v2436_v0, %v902_v31 }
 0x135   : > { %v566_v19 = vadd.f32 %v564_v15, %v552_v12  ;;  %v740_v20 = vpop.permute.xlu1 %739  ;;  %v650_v21 = vpop.permute.xlu0 %649  ;;  %v905_v44 = vadd.f32 %v903_v1, %v2344_v2  ;;  %v466_v1 = vld [vmem:[#allocation9] ss:$8 sm:$0x3] }
 0x136   : > { %v651_v28 = vrot.slane %v650_v21, 7  ;;  %v741_v36 = vrot.slane %v740_v20, 7 }
 0x137   : > { %570 = vrot.lane.b32.xlu1 %v566_v19, %s1678_s17  ;;  %v817_v19 = vadd.f32 %v815_v59, %v803_v48 }
 0x138   : > { %v652_v7 = vsel %vm447_vm7, %v651_v28, %v650_v21  ;;  %v742_v47 = vsel %vm432_vm6, %v741_v36, %v740_v20 }
 0x139   : > { %v915_v30 = vpop.permute.xlu1 %914  ;;  %v827_v5 = vpop.permute.xlu0 %826  ;;  %v654_v8 = vadd.f32 %v652_v7, %v640_v13  ;;  %v744_v56 = vadd.f32 %v742_v47, %v730_v49 }
 0x13a   : > { %v828_v50 = vrot.slane %v827_v5, 7  ;;  %v916_v60 = vrot.slane %v915_v30, 1 }
 0x13c   : > { %v829_v23 = vsel %vm415_vm5, %v828_v50, %v827_v5  ;;  %v917_v27 = vsel %vm400_vm4, %v915_v30, %v916_v60 }
 0x13d   : > { %v664_v26 = vpop.permute.xlu1 %663  ;;  %v1003_v53 = vpop.permute.xlu0 %1002  ;;  %v831_v0 = vadd.f32 %v829_v23, %v817_v19  ;;  %v919_v16 = vadd.f32 %v917_v27, %v905_v44 }
 0x13e   : > { %v665_v18 = vrot.slane %v664_v26, 7  ;;  %v1004_v20 = vrot.slane %v1003_v53, 1 }
 0x140   : > { %v666_v9 = vsel %vm462_vm8, %v665_v18, %v664_v26  ;;  %v1005_v3 = vsel %vm385_vm3, %v1003_v53, %v1004_v20 }
 0x141   : > { %v668_v22 = vadd.f32 %v666_v9, %v654_v8  ;;  %v841_v32 = vpop.permute.xlu1 %840  ;;  %v754_v33 = vpop.permute.xlu0 %753 }
 0x142   : > { %v755_v42 = vrot.slane %v754_v33, 7  ;;  %v842_v61 = vrot.slane %v841_v32, 7 }
 0x143   : > { %672 = vrot.lane.b32.xlu0 %v668_v22, %s1679_s18  ;;  %v1007_v22 = vadd.f32 %v1005_v3, %v2352_v4 }
 0x144   : > { %v756_v51 = vsel %vm447_vm7, %v755_v42, %v754_v33  ;;  %v843_v39 = vsel %vm432_vm6, %v842_v61, %v841_v32 }
 0x145   : > { %v1017_v43 = vpop.permute.xlu1 %1016  ;;  %v929_v45 = vpop.permute.xlu0 %928  ;;  %v758_v12 = vadd.f32 %v756_v51, %v744_v56  ;;  %v845_v6 = vadd.f32 %v843_v39, %v831_v0 }
 0x146   : > { %v930_v14 = vrot.slane %v929_v45, 7  ;;  %v1018_v28 = vrot.slane %v1017_v43, 1 }
 0x148   : > { %v931_v29 = vsel %vm415_vm5, %v930_v14, %v929_v45  ;;  %v1019_v52 = vsel %vm400_vm4, %v1017_v43, %v1018_v28  ;;  %v568_v14 = vld [vmem:[#allocation9 + $0x1] ss:$8 sm:$0x3] }
 0x149   : > { %v855_v57 = vpop.permute.xlu1 %854  ;;  %v768_v55 = vpop.permute.xlu0 %767  ;;  %v933_v2 = vadd.f32 %v931_v29, %v919_v16  ;;  %v1021_v40 = vadd.f32 %v1019_v52, %v1007_v22  ;;  %v1079_v52 = vld [vmem:[#allocation9 + $0x6] ss:$8 sm:$0x3] }
 0x14a   : > { %v769_v62 = vrot.slane %v768_v55, 7  ;;  %v856_v11 = vrot.slane %v855_v57, 7 }
 0x14c   : > { %v770_v15 = vsel %vm462_vm8, %v769_v62, %v768_v55  ;;  %v857_v5 = vsel %vm447_vm7, %v856_v11, %v855_v57 }
 0x14d   : > { %v772_v21 = vadd.f32 %v770_v15, %v758_v12  ;;  %v1031_v24 = vpop.permute.xlu1 %1030  ;;  %v943_v54 = vpop.permute.xlu0 %942  ;;  %v859_v8 = vadd.f32 %v857_v5, %v845_v6  ;;  %v875_v5 = vld [vmem:[#allocation9 + $0x4] ss:$8 sm:$0x3] }
 0x14e   : > { %v944_v17 = vrot.slane %v943_v54, 7  ;;  %v1032_v30 = vrot.slane %v1031_v24, 7 }
 0x14f   : > { %776 = vrot.lane.b32.xlu1 %v772_v21, %s2635_s24  ;;  %v364_v21 = vstv %s363_s30 }
 0x150   : > { %v945_v26 = vsel %vm432_vm6, %v944_v17, %v943_v54  ;;  %v1033_v36 = vsel %vm415_vm5, %v1032_v30, %v1031_v24  ;;  %v670_v24 = vld [vmem:[#allocation9 + $0x2] ss:$8 sm:$0x3]  ;;  %v774_v17 = vld [vmem:[#allocation9 + $0x3] ss:$8 sm:$0x3] }
 0x151   : > { %v957_v7 = vpop.permute.xlu1 %956  ;;  %v869_v13 = vpop.permute.xlu0 %868  ;;  %v947_v32 = vadd.f32 %v945_v26, %v933_v2  ;;  %v1035_v45 = vadd.f32 %v1033_v36, %v1021_v40 }
 0x152   : > { %v958_v63 = vrot.slane %v957_v7, 7  ;;  %v870_v18 = vrot.slane %v869_v13, 7 }
 0x154   : > { %v959_v58 = vsel %vm447_vm7, %v958_v63, %v957_v7  ;;  %v871_v9 = vsel %vm462_vm8, %v870_v18, %v869_v13  ;;  %v977_v13 = vld [vmem:[#allocation9 + $0x5] ss:$8 sm:$0x3] }
 0x155   : > { %v873_v53 = vadd.f32 %v871_v9, %v859_v8  ;;  %v971_v33 = vpop.permute.xlu1 %970  ;;  %v1045_v34 = vpop.permute.xlu0 %1044  ;;  %v961_v42 = vadd.f32 %v959_v58, %v947_v32 }
 0x156   : > { %v972_v37 = vrot.slane %v971_v33, 7  ;;  %v1046_v38 = vrot.slane %v1045_v34, 7 }
 0x157   : > { %877 = vrot.lane.b32.xlu0 %v873_v53, %s1680_s7 }
 0x158   : > { %v973_v35 = vsel %vm462_vm8, %v972_v37, %v971_v33  ;;  %v1047_v43 = vsel %vm432_vm6, %v1046_v38, %v1045_v34 }
 0x159   : > { %v975_v46 = vadd.f32 %v973_v35, %v961_v42  ;;  %v1073_v47 = vpop.permute.xlu1 %1072  ;;  %v1059_v4 = vpop.permute.xlu0 %1058  ;;  %v1049_v10 = vadd.f32 %v1047_v43, %v1035_v45 }
 0x15a   : > { %v1074_v49 = vrot.slane %v1073_v47, 7  ;;  %v1060_v31 = vrot.slane %v1059_v4, 7 }
 0x15b   : > { %979 = vrot.lane.b32.xlu1 %v975_v46, %s1681_s2 }
 0x15c   : > { %v1061_v50 = vsel %vm447_vm7, %v1060_v31, %v1059_v4  ;;  %v1075_v56 = vsel %vm462_vm8, %v1074_v49, %v1073_v47 }
 0x15d   : > { %v1063_v51 = vadd.f32 %v1061_v50, %v1049_v10 }
 0x15f   : > { %v1077_v57 = vadd.f32 %v1075_v56, %v1063_v51 }
 0x161   : > { %1081 = vrot.lane.b32.xlu0 %v1077_v57, %s1682_s15 }
 0x19d   : > { %v469_v55 = vpop.permute.xlu0 %468 }
 0x19e   : > { %v470_v60 = vrot.slane %v469_v55, 1 }
 0x1a0   : > { %v472_v12 = vsel %vm471_vm9, %v469_v55, %v470_v60 }
 0x1a1   : > { %v474_v19 = vmul.f32 %v472_v12, %v466_v1 }
 0x1a3   : > { %v475_v0 = vadd.f32 %v474_v19, %v364_v21 }
 0x1a9   : > { %v571_v59 = vpop.permute.xlu1 %570 }
 0x1aa   : > { %v572_v62 = vrot.slane %v571_v59, 1 }
 0x1ac   : > { %v574_v11 = vsel %vm573_vm10, %v571_v59, %v572_v62 }
 0x1ad   : > { %v576_v39 = vmul.f32 %v574_v11, %v568_v14 }
 0x1af   : > { %v577_v6 = vadd.f32 %v576_v39, %v475_v0 }
 0x1b5   : > { %v673_v61 = vpop.permute.xlu0 %672 }
 0x1b6   : > { %v674_v23 = vrot.slane %v673_v61, 1 }
 0x1b8   : > { %v676_v54 = vsel %vm675_vm11, %v673_v61, %v674_v23 }
 0x1b9   : > { %v678_v28 = vmul.f32 %v676_v54, %v670_v24 }
 0x1bb   : > { %v679_v26 = vadd.f32 %v678_v28, %v577_v6 }
 0x1c1   : > { %v777_v48 = vpop.permute.xlu1 %776 }
 0x1c2   : > { %v778_v15 = vrot.slane %v777_v48, 1 }
 0x1c4   : > { %v779_v44 = vsel %vm447_vm7, %v777_v48, %v778_v15 }
 0x1c5   : > { %v781_v7 = vmul.f32 %v779_v44, %v774_v17 }
 0x1c7   : > { %v782_v18 = vadd.f32 %v781_v7, %v679_v26 }
 0x1c9   : > { %v878_v20 = vpop.permute.xlu0 %877 }
 0x1ca   : > { %v879_v27 = vrot.slane %v878_v20, 1 }
 0x1cc   : > { %v881_v16 = vsel %vm880_vm12, %v878_v20, %v879_v27 }
 0x1cd   : > { %v980_v29 = vpop.permute.xlu1 %979  ;;  %v883_v63 = vmul.f32 %v881_v16, %v875_v5 }
 0x1ce   : > { %v981_v3 = vrot.slane %v980_v29, 1 }
 0x1cf   : > { %v884_v9 = vadd.f32 %v883_v63, %v782_v18 }
 0x1d0   : > { %v983_v30 = vsel %vm982_vm13, %v980_v29, %v981_v3 }
 0x1d1   : > { %v985_v2 = vmul.f32 %v983_v30, %v977_v13 }
 0x1d3   : > { %v1082_v8 = vpop.permute.xlu0 %1081  ;;  %v986_v32 = vadd.f32 %v985_v2, %v884_v9 }
 0x1d4   : > { %v1083_v58 = vrot.slane %v1082_v8, 1 }
 0x1d6   : > { %v1085_v22 = vsel %vm1084_vm14, %v1082_v8, %v1083_v58 }
 0x1d7   : > { %v1087_v53 = vmul.f32 %v1085_v22, %v1079_v52 }
 0x1d9   : > { %v1088_v33 = vadd.f32 %v1087_v53, %v986_v32 }
 0x1db   : > { %v1382_v34 = vmul.f32 -1.442695, %v1088_v33 }
 0x1dd   : > { %1481 = vpow2.f32 %v1382_v34 }
 0x1e7   : > { %v1482_v36 = vpop.eup %1481 }
 0x1e8   : > { %v1092_v37 = vadd.f32 1.0, %v1482_v36 }
 0x1ea   : > { %1483 = vrcp.f32 %v1092_v37 }
 0x1f4   : > { %v1484_v38 = vpop.eup %1483 }
 0x1f5   : > { %1095 = vst.msk [vmem:[%s2489_s6] sm:$0x3] %vm1907_vm2, %v1484_v38 }
 0x1f6   : > { %1571 = shalt.err (!%p1568_p6)
}
 0x1f7   : > { %s1572_s21 = scalar_lea.hbm %s2495_s29, 32  ;;  %s1576_s14 = scalar_lea.hbm %s2583_s5, 64 }
 0x1f8   : > { %p1573_p13 = scmp.ne.s32.totalorder %s2495_s29, %s1572_s21  ;;  %p1577_p0 = scmp.lt.u32.totalorder %s2495_s29, %s2583_s5 }
 0x1f9   : > { %p1578_p4 = scmp.lt.u32.totalorder %s1576_s14, %s1572_s21  ;;  %p1580_p3 = scmp.lt.u32.totalorder %s1572_s21, %s2495_s29 }
 0x1fa   : > { %p1574_p10 = pnand %p1573_p13, %p2636_p11 }
 0x1fb   : > { %p1579_p8 = por %p1578_p4, %p1577_p0 }
 0x1fc   : > { %p1575_p12 = pneg %p1574_p10 }
 0x1fd   : > { %p1581_p9 = por %p1580_p3, %p1579_p8 }
 0x1ff   : > { %p1582_p5 = pnand %p1581_p9, %p1575_p12 }
 0x201   : > { %1585 = shalt.err (!%p1582_p5)
}
 0x202   : > { %1405 = dma.vmem_to_hbm [thread:$0]  (%p2636_p11), %s2497_s19, 32, %s2495_s29, %s1117_s23   ;;  %v1101_v41 = vsub.s32 0, %v1892_v25  ;;  %v1105_v40 = vsub.s32 1, %v1892_v25  ;;  %v1096_v42 = vld [vmem:[%s2489_s6] sm:$0x3] }
 0x203   : > { %v1097_v45 = vld [vmem:[%s1885_s16] sm:$0xff]  ;;  %s1392_s18 = sshll.u32 %s1739_s1, 7  ;;  %s2637_s7 = sshll.u32 %s1879_s10, 3 }
 0x204   : > { %v1102_v35 = vrot.slane %v1096_v42, %v1101_v41  ;;  %v1106_v43 = vrot.slane %v1096_v42, %v1105_v40  ;;  %s272_s2 = scalar_lea.vmem [#allocation12], %s2637_s7  ;;  %s2534_s3 = scalar_lea.hbm %s2582_s4, %s1392_s18 }
 0x205   : > { %s1131_s15 = sshll.u32 %s272_s2, 4  ;;  %s1112_s6 = scalar_lea.sflag [#allocation7], %s1879_s10  ;;  %s2536_s15 = int_to_ptr.vmem [resolvable:$true] %s1131_s15 }
 0x206   : > { %v1107_v46 = vcombine.low %v1102_v35, %v1106_v43  ;;  %s1586_s19 = scalar_lea.vmem %s2536_s15, 128  ;;  %s1684_s1 = smov [#allocation12]  }
 0x207   : > { %p1587_p7 = scmp.ne.s32.totalorder %s2536_s15, %s1586_s19  ;;  %s1590_s16 = sshll.u32 %s1684_s1, 4  ;;  %s1591_s16 = int_to_ptr.vmem [resolvable:$false] %s1590_s16 }
 0x208   : > { %v1109_v47 = vmul.f32 %v1107_v46, %v1097_v45  ;;  %s1592_s24 = scalar_lea.vmem %s1591_s16, 256  ;;  %p1593_p6 = scmp.lt.s32.totalorder %s2536_s15, %s1591_s16 }
 0x209   : > { %p1588_p1 = pnand %p1587_p7, %p2636_p11  ;;  %p1594_p13 = scmp.lt.s32.totalorder %s1592_s24, %s1586_s19 }
 0x20a   : > { %1110 = vst [vmem:[%s272_s2] sm:$0xff] %v1109_v47 }
 0x20b   : > { %p1589_p2 = pneg %p1588_p1  ;;  %p1595_p10 = por %p1594_p13, %p1593_p6 }
 0x20d   : > { %p1596_p12 = pnand %p1595_p10, %p1589_p2 }
 0x20f   : > { %1599 = shalt.err (!%p1596_p12)
}
 0x210   : > { %s1600_s10 = scalar_lea.hbm %s2534_s3, 128  ;;  %s1604_s23 = scalar_lea.hbm %s2582_s4, 256 }
 0x211   : > { %p1601_p0 = scmp.ne.s32.totalorder %s2534_s3, %s1600_s10  ;;  %p1605_p3 = scmp.lt.u32.totalorder %s2534_s3, %s2582_s4 }
 0x212   : > { %p1606_p9 = scmp.lt.u32.totalorder %s1604_s23, %s1600_s10  ;;  %p1608_p7 = scmp.lt.u32.totalorder %s1600_s10, %s2534_s3 }
 0x213   : > { %p1602_p4 = pnand %p1601_p0, %p2636_p11 }
 0x214   : > { %p1607_p5 = por %p1606_p9, %p1605_p3 }
 0x215   : > { %p1603_p8 = pneg %p1602_p4 }
 0x216   : > { %p1609_p1 = por %p1608_p7, %p1607_p5 }
 0x218   : > { %p1610_p2 = pnand %p1609_p1, %p1603_p8 }
 0x21a   : > { %1613 = shalt.err (!%p1610_p2)
}
 0x21b   : > { %1404 = dma.vmem_to_hbm [thread:$0]  (%p2636_p11), %s2536_s15, 128, %s2534_s3, %s1112_s6  }
 0x21c PF: > { %s2638_s11 = sld [smem:[#allocation22_spill]]  ;;  %s1157_s13 = sand.u32 1, %s1652_s20  }
 0x21d   : > { %p2639_p6 = scmp.ne.s32.totalorder %s2612_s26, 0  ;;  %s1158_s21 = scalar_lea.sflag [#allocation7], %s1157_s13 }
 0x222   : > { %p2640_p13 = scmp.ge.s32.totalorder %s2638_s11, 2 }
 0x224   : > { %p1420_p10 = pnand %p2640_p13, %p2639_p6 }
 0x226   : > { %1643 = dma.done.wait (!%p1420_p10), %s1158_s21, 128  }
 0x227   : > { %1645 = vsyncadd (!%p1420_p10), %s1158_s21, 4294967168  ;;  %s1167_s28 = scalar_lea.sflag [#allocation14], %s1157_s13 }
 0x228   : > { %1647 = dma.done.wait (!%p1420_p10), %s1167_s28, 32  }
 0x229   : > { %1649 = vsyncadd (!%p1420_p10), %s1167_s28, 4294967264  ;;  %s2641_s23 = sld [smem:[#allocation23_spill]]  ;;  %s2642_s20 = sld [smem:[#allocation20_spill]] }
 0x22a   : > { %s2643_s21 = sld [smem:[#allocation21_spill]]  ;;  %s2644_s22 = sld [smem:[#allocation24_spill]] }
 0x22f   : > { %p25_p11 = scmp.ge.s32.totalorder %s2641_s23, 4  }
 0x231   :  { %27 = sbr.rel (!%p25_p11) target bundleno = 14 (0xe), region = 114 }
 0x238   :  { %1172 = vsyncpa [#allocation6], 1 }
 0x239   :  { %1174 = vsyncpa [#allocation6 + $0x1], 1 }
 0x23a   :  { %1175 = vsyncpa [#allocation11], 1 }
 0x23b   :  { %1177 = vsyncpa [#allocation11 + $0x1], 1 }
 0x23c   :  { %1178 = vsyncpa [#allocation7], 1 }
 0x23d   :  { %1180 = vsyncpa [#allocation7 + $0x1], 1 }
 0x23e   :  { %1181 = vsyncpa [#allocation14], 1 }
 0x23f   :  { %1183 = vsyncpa [#allocation14 + $0x1], 1 }
 0x240   :  { %1184 = vsyncpa [#allocation8], 1 }
 0x241   :  { %1186 = vsyncpa [#allocation8 + $0x1], 1 }

</bundles_post_ra>
